<compile_context>
chip_gen: v7x
topology: tpu7x:2x2x1
jax: 0.10.0
libtpu: 0.0.40
codegen_flags: <defaults>
</compile_context>

<pallas_src>
import functools

import jax
import jax.numpy as jnp
from jax.experimental import pallas as pl
from jax.experimental.pallas import tpu as pltpu


# ----------------------------------------------------------------------------
# Fused kernel: 2 stacked LSTM layers (unrolled over time) + classifier head.
# Gate order matches PyTorch nn.LSTM: [i, f, g, o].
# ----------------------------------------------------------------------------
def _lstm_cell_update(gates, c_prev, hidden):
    H = hidden
    i_g = jax.nn.sigmoid(gates[:, 0 * H:1 * H])
    f_g = jax.nn.sigmoid(gates[:, 1 * H:2 * H])
    g_g = jnp.tanh(gates[:, 2 * H:3 * H])
    o_g = jax.nn.sigmoid(gates[:, 3 * H:4 * H])
    c_new = f_g * c_prev + i_g * g_g
    h_new = o_g * jnp.tanh(c_new)
    return h_new, c_new


def _lstm_net_kernel(*refs, seq_len, batch, hidden, num_layers):
    T, B, H = seq_len, batch, hidden
    f32 = jnp.float32

    out_ref = refs[-1]
    it = iter(refs[:-1])
    x2d = next(it)[...]          # (T*B, E)   time-major, flattened
    wih0 = next(it)[...]         # (E, 4H)
    whh0 = next(it)[...]         # (H, 4H)
    b0 = next(it)[...]           # (1, 4H)    b_ih + b_hh, layer 0
    deep = []                    # layers 1..L-1: (W_cat (2H,4H), bias (1,4H))
    for _ in range(num_layers - 1):
        w_cat = next(it)[...]
        b_l = next(it)[...]
        deep.append((w_cat, b_l))
    w1 = next(it)[...]           # (H, 64)
    b1 = next(it)[...]           # (1, 64)
    w2 = next(it)[...]           # (64, 1)
    b2 = next(it)[...]           # (1, 1)

    # Hoisted layer-0 input projection: one (T*B,E)x(E,4H) matmul for all timesteps.
    gih0 = jnp.dot(x2d, wih0, preferred_element_type=f32) + b0      # (T*B, 4H)

    h = [jnp.zeros((B, H), f32) for _ in range(num_layers)]
    c = [jnp.zeros((B, H), f32) for _ in range(num_layers)]

    # Fully unrolled time loop (T is small and static); h/c carried as values.
    for t in range(T):
        gates0 = gih0[t * B:(t + 1) * B, :] + jnp.dot(
            h[0], whh0, preferred_element_type=f32)                 # (B, 4H)
        h[0], c[0] = _lstm_cell_update(gates0, c[0], H)

        x_in = h[0]
        for layer in range(1, num_layers):
            w_cat, b_l = deep[layer - 1]
            gates = jnp.dot(jnp.concatenate([x_in, h[layer]], axis=-1),
                            w_cat, preferred_element_type=f32) + b_l
            h[layer], c[layer] = _lstm_cell_update(gates, c[layer], H)
            x_in = h[layer]

    # Classifier on the last timestep of the last layer.
    # TODO(synk): Dropout(p=0.3) omitted (inference mode; identity in eval()).
    h_last = h[num_layers - 1]                                       # (B, H)
    z = jnp.dot(h_last, w1, preferred_element_type=f32) + b1         # (B, 64)
    y = jnp.dot(z, w2, preferred_element_type=f32) + b2              # (B, 1)
    out_ref[...] = jax.nn.sigmoid(y).astype(out_ref.dtype)


# ----------------------------------------------------------------------------
# Full forward pass (mirrors LSTM_Net.forward, eval mode).
# ----------------------------------------------------------------------------
@functools.partial(jax.jit, static_argnames=("num_layers",))
def lstm_net_forward(token_ids, params, num_layers):
    B, T = token_ids.shape
    emb = params["embedding"]
    E = emb.shape[1]
    H = params["whh0_t"].shape[0]

    # Frozen-embedding gather + time-major flatten (pure data movement, one XLA fusion).
    x = jnp.take(emb, token_ids, axis=0)                 # (B, T, E)
    x2d = jnp.transpose(x, (1, 0, 2)).reshape(T * B, E)  # (T*B, E), time-major

    inputs = [x2d, params["wih0_t"], params["whh0_t"], params["b_0"]]
    for layer in range(1, num_layers):
        inputs += [params[f"wcat_t_{layer}"], params[f"b_{layer}"]]
    inputs += [params["w1_t"], params["b1"], params["w2_t"], params["b2"]]

    kernel = functools.partial(
        _lstm_net_kernel, seq_len=T, batch=B, hidden=H, num_layers=num_layers)

    vmem_spec = pl.BlockSpec(memory_space=pltpu.MemorySpace.VMEM)
    return pl.pallas_call(
        kernel,
        out_shape=jax.ShapeDtypeStruct((B, 1), jnp.float32),
        in_specs=[vmem_spec] * len(inputs),
        out_specs=vmem_spec,
    )(*inputs)                                            # (B, 1)


# ----------------------------------------------------------------------------
# Deterministic parameter construction (shapes follow nn.LSTM / nn.Linear).
# ----------------------------------------------------------------------------
def make_params(key, vocab, embedding_dim, hidden_dim, num_layers):
    keys = jax.random.split(key, 5 + 4 * num_layers)
    k = iter(keys)
    scale = 0.1
    params = {
        "embedding": scale * jax.random.normal(
            next(k), (vocab, embedding_dim), jnp.float32)
    }
    for layer in range(num_layers):
        in_dim = embedding_dim if layer == 0 else hidden_dim
        w_ih = scale * jax.random.normal(next(k), (4 * hidden_dim, in_dim), jnp.float32)
        w_hh = scale * jax.random.normal(next(k), (4 * hidden_dim, hidden_dim), jnp.float32)
        b_ih = scale * jax.random.normal(next(k), (4 * hidden_dim,), jnp.float32)
        b_hh = scale * jax.random.normal(next(k), (4 * hidden_dim,), jnp.float32)
        bias = (b_ih + b_hh).reshape(1, 4 * hidden_dim)
        if layer == 0:
            params["wih0_t"] = w_ih.T                        # (E, 4H)
            params["whh0_t"] = w_hh.T                        # (H, 4H)
            params["b_0"] = bias
        else:
            # Pre-concatenated [W_ih; W_hh] so the recurrence is one matmul per step.
            params[f"wcat_t_{layer}"] = jnp.concatenate([w_ih.T, w_hh.T], axis=0)  # (2H, 4H)
            params[f"b_{layer}"] = bias
    w1 = scale * jax.random.normal(next(k), (64, hidden_dim), jnp.float32)   # Linear(H,64)
    b1 = scale * jax.random.normal(next(k), (64,), jnp.float32)
    w2 = scale * jax.random.normal(next(k), (1, 64), jnp.float32)            # Linear(64,1)
    b2 = scale * jax.random.normal(next(k), (1,), jnp.float32)
    params["w1_t"] = w1.T
    params["b1"] = b1.reshape(1, 64)
    params["w2_t"] = w2.T
    params["b2"] = b2.reshape(1, 1)
    return params


if __name__ == "__main__":
    # Small shapes consistent with the module: batch=2, seq=8, emb=16, hidden=32, layers=2.
    VOCAB, EMB, HID, LAYERS, BATCH, SEQ = 50, 16, 32, 2, 2, 8

    key = jax.random.PRNGKey(0)
    pkey, ikey = jax.random.split(key)
    params = make_params(pkey, VOCAB, EMB, HID, LAYERS)
    token_ids = jax.random.randint(ikey, (BATCH, SEQ), 0, VOCAB, dtype=jnp.int32)

    out = lstm_net_forward(token_ids, params, num_layers=LAYERS)
    jax.block_until_ready(out)
    assert out.shape == (BATCH, 1)
    assert bool(jnp.all(jnp.isfinite(out)))
    print("KERNEL_OK")
</pallas_src>

<mosaic_0001>
module attributes {stable_mosaic.version = 11 : i64} {
  func.func @_lstm_net_kernel(%arg0: memref<16x16xf32, #tpu.memory_space<vmem>>, %arg1: memref<16x128xf32, #tpu.memory_space<vmem>>, %arg2: memref<32x128xf32, #tpu.memory_space<vmem>>, %arg3: memref<1x128xf32, #tpu.memory_space<vmem>>, %arg4: memref<64x128xf32, #tpu.memory_space<vmem>>, %arg5: memref<1x128xf32, #tpu.memory_space<vmem>>, %arg6: memref<32x64xf32, #tpu.memory_space<vmem>>, %arg7: memref<1x64xf32, #tpu.memory_space<vmem>>, %arg8: memref<64x1xf32, #tpu.memory_space<vmem>>, %arg9: memref<1x1xf32, #tpu.memory_space<vmem>>, %arg10: memref<2x1xf32, #tpu.memory_space<vmem>>) attributes {dimension_semantics = [], scalar_prefetch = 0 : i64, scratch_operands = 0 : i64, tpu.core_type = #tpu.core_type<tc>} {
    %c0 = arith.constant 0 : index
    %c0_0 = arith.constant 0 : index
    %0 = vector.load %arg0[%c0, %c0_0] : memref<16x16xf32, #tpu.memory_space<vmem>>, vector<16x16xf32>
    %c0_1 = arith.constant 0 : index
    %c0_2 = arith.constant 0 : index
    %1 = vector.load %arg1[%c0_1, %c0_2] : memref<16x128xf32, #tpu.memory_space<vmem>>, vector<16x128xf32>
    %c0_3 = arith.constant 0 : index
    %c0_4 = arith.constant 0 : index
    %2 = vector.load %arg2[%c0_3, %c0_4] : memref<32x128xf32, #tpu.memory_space<vmem>>, vector<32x128xf32>
    %c0_5 = arith.constant 0 : index
    %c0_6 = arith.constant 0 : index
    %3 = vector.load %arg3[%c0_5, %c0_6] : memref<1x128xf32, #tpu.memory_space<vmem>>, vector<1x128xf32>
    %c0_7 = arith.constant 0 : index
    %c0_8 = arith.constant 0 : index
    %4 = vector.load %arg4[%c0_7, %c0_8] : memref<64x128xf32, #tpu.memory_space<vmem>>, vector<64x128xf32>
    %c0_9 = arith.constant 0 : index
    %c0_10 = arith.constant 0 : index
    %5 = vector.load %arg5[%c0_9, %c0_10] : memref<1x128xf32, #tpu.memory_space<vmem>>, vector<1x128xf32>
    %c0_11 = arith.constant 0 : index
    %c0_12 = arith.constant 0 : index
    %6 = vector.load %arg6[%c0_11, %c0_12] : memref<32x64xf32, #tpu.memory_space<vmem>>, vector<32x64xf32>
    %c0_13 = arith.constant 0 : index
    %c0_14 = arith.constant 0 : index
    %7 = vector.load %arg7[%c0_13, %c0_14] : memref<1x64xf32, #tpu.memory_space<vmem>>, vector<1x64xf32>
    %c0_15 = arith.constant 0 : index
    %c0_16 = arith.constant 0 : index
    %8 = vector.load %arg8[%c0_15, %c0_16] : memref<64x1xf32, #tpu.memory_space<vmem>>, vector<64x1xf32>
    %c0_17 = arith.constant 0 : index
    %c0_18 = arith.constant 0 : index
    %9 = vector.load %arg9[%c0_17, %c0_18] : memref<1x1xf32, #tpu.memory_space<vmem>>, vector<1x1xf32>
    %cst = arith.constant dense<0.000000e+00> : vector<16x128xf32>
    %10 = tpu.matmul %0, %1, %cst {dimension_numbers = #tpu.dot_dimension_numbers<[1], [0], [0], [1], [0, 0, 1, 1], [], []>} : vector<16x16xf32>, vector<16x128xf32>, vector<16x128xf32> -> vector<16x128xf32>
    %11 = vector.broadcast %3 : vector<1x128xf32> to vector<16x128xf32>
    %12 = arith.addf %10, %11 : vector<16x128xf32>
    %cst_19 = arith.constant 0.000000e+00 : f32
    %13 = vector.broadcast %cst_19 : f32 to vector<2x32xf32>
    %cst_20 = arith.constant 0.000000e+00 : f32
    %14 = vector.broadcast %cst_20 : f32 to vector<2x32xf32>
    %cst_21 = arith.constant 0.000000e+00 : f32
    %15 = vector.broadcast %cst_21 : f32 to vector<2x32xf32>
    %cst_22 = arith.constant 0.000000e+00 : f32
    %16 = vector.broadcast %cst_22 : f32 to vector<2x32xf32>
    %17 = vector.extract_strided_slice %12 {offsets = [0, 0], sizes = [2, 128], strides = [1, 1]} : vector<16x128xf32> to vector<2x128xf32>
    %cst_23 = arith.constant dense<0.000000e+00> : vector<2x128xf32>
    %18 = tpu.matmul %13, %2, %cst_23 {dimension_numbers = #tpu.dot_dimension_numbers<[1], [0], [0], [1], [0, 0, 1, 1], [], []>} : vector<2x32xf32>, vector<32x128xf32>, vector<2x128xf32> -> vector<2x128xf32>
    %19 = arith.addf %17, %18 : vector<2x128xf32>
    %20 = vector.extract_strided_slice %19 {offsets = [0, 0], sizes = [2, 32], strides = [1, 1]} : vector<2x128xf32> to vector<2x32xf32>
    %21 = arith.negf %20 : vector<2x32xf32>
    %22 = math.exp %21 : vector<2x32xf32>
    %cst_24 = arith.constant 1.000000e+00 : f32
    %23 = vector.broadcast %cst_24 : f32 to vector<2x32xf32>
    %24 = arith.addf %23, %22 : vector<2x32xf32>
    %25 = arith.divf %23, %24 : vector<2x32xf32>
    %26 = vector.extract_strided_slice %19 {offsets = [0, 32], sizes = [2, 32], strides = [1, 1]} : vector<2x128xf32> to vector<2x32xf32>
    %27 = arith.negf %26 : vector<2x32xf32>
    %28 = math.exp %27 : vector<2x32xf32>
    %cst_25 = arith.constant 1.000000e+00 : f32
    %29 = vector.broadcast %cst_25 : f32 to vector<2x32xf32>
    %30 = arith.addf %29, %28 : vector<2x32xf32>
    %31 = arith.divf %29, %30 : vector<2x32xf32>
    %32 = vector.extract_strided_slice %19 {offsets = [0, 64], sizes = [2, 32], strides = [1, 1]} : vector<2x128xf32> to vector<2x32xf32>
    %33 = math.tanh %32 : vector<2x32xf32>
    %34 = vector.extract_strided_slice %19 {offsets = [0, 96], sizes = [2, 32], strides = [1, 1]} : vector<2x128xf32> to vector<2x32xf32>
    %35 = arith.negf %34 : vector<2x32xf32>
    %36 = math.exp %35 : vector<2x32xf32>
    %cst_26 = arith.constant 1.000000e+00 : f32
    %37 = vector.broadcast %cst_26 : f32 to vector<2x32xf32>
    %38 = arith.addf %37, %36 : vector<2x32xf32>
    %39 = arith.divf %37, %38 : vector<2x32xf32>
    %40 = arith.mulf %31, %15 : vector<2x32xf32>
    %41 = arith.mulf %25, %33 : vector<2x32xf32>
    %42 = arith.addf %40, %41 : vector<2x32xf32>
    %43 = math.tanh %42 : vector<2x32xf32>
    %44 = arith.mulf %39, %43 : vector<2x32xf32>
    %45 = tpu.concatenate %44, %14 in 1 : vector<2x32xf32>, vector<2x32xf32> -> vector<2x64xf32>
    %cst_27 = arith.constant dense<0.000000e+00> : vector<2x128xf32>
    %46 = tpu.matmul %45, %4, %cst_27 {dimension_numbers = #tpu.dot_dimension_numbers<[1], [0], [0], [1], [0, 0, 1, 1], [], []>} : vector<2x64xf32>, vector<64x128xf32>, vector<2x128xf32> -> vector<2x128xf32>
    %47 = vector.broadcast %5 : vector<1x128xf32> to vector<2x128xf32>
    %48 = arith.addf %46, %47 : vector<2x128xf32>
    %49 = vector.extract_strided_slice %48 {offsets = [0, 0], sizes = [2, 32], strides = [1, 1]} : vector<2x128xf32> to vector<2x32xf32>
    %50 = arith.negf %49 : vector<2x32xf32>
    %51 = math.exp %50 : vector<2x32xf32>
    %cst_28 = arith.constant 1.000000e+00 : f32
    %52 = vector.broadcast %cst_28 : f32 to vector<2x32xf32>
    %53 = arith.addf %52, %51 : vector<2x32xf32>
    %54 = arith.divf %52, %53 : vector<2x32xf32>
    %55 = vector.extract_strided_slice %48 {offsets = [0, 32], sizes = [2, 32], strides = [1, 1]} : vector<2x128xf32> to vector<2x32xf32>
    %56 = arith.negf %55 : vector<2x32xf32>
    %57 = math.exp %56 : vector<2x32xf32>
    %cst_29 = arith.constant 1.000000e+00 : f32
    %58 = vector.broadcast %cst_29 : f32 to vector<2x32xf32>
    %59 = arith.addf %58, %57 : vector<2x32xf32>
    %60 = arith.divf %58, %59 : vector<2x32xf32>
    %61 = vector.extract_strided_slice %48 {offsets = [0, 64], sizes = [2, 32], strides = [1, 1]} : vector<2x128xf32> to vector<2x32xf32>
    %62 = math.tanh %61 : vector<2x32xf32>
    %63 = vector.extract_strided_slice %48 {offsets = [0, 96], sizes = [2, 32], strides = [1, 1]} : vector<2x128xf32> to vector<2x32xf32>
    %64 = arith.negf %63 : vector<2x32xf32>
    %65 = math.exp %64 : vector<2x32xf32>
    %cst_30 = arith.constant 1.000000e+00 : f32
    %66 = vector.broadcast %cst_30 : f32 to vector<2x32xf32>
    %67 = arith.addf %66, %65 : vector<2x32xf32>
    %68 = arith.divf %66, %67 : vector<2x32xf32>
    %69 = arith.mulf %60, %16 : vector<2x32xf32>
    %70 = arith.mulf %54, %62 : vector<2x32xf32>
    %71 = arith.addf %69, %70 : vector<2x32xf32>
    %72 = math.tanh %71 : vector<2x32xf32>
    %73 = arith.mulf %68, %72 : vector<2x32xf32>
    %74 = vector.extract_strided_slice %12 {offsets = [2, 0], sizes = [2, 128], strides = [1, 1]} : vector<16x128xf32> to vector<2x128xf32>
    %cst_31 = arith.constant dense<0.000000e+00> : vector<2x128xf32>
    %75 = tpu.matmul %44, %2, %cst_31 {dimension_numbers = #tpu.dot_dimension_numbers<[1], [0], [0], [1], [0, 0, 1, 1], [], []>} : vector<2x32xf32>, vector<32x128xf32>, vector<2x128xf32> -> vector<2x128xf32>
    %76 = arith.addf %74, %75 : vector<2x128xf32>
    %77 = vector.extract_strided_slice %76 {offsets = [0, 0], sizes = [2, 32], strides = [1, 1]} : vector<2x128xf32> to vector<2x32xf32>
    %78 = arith.negf %77 : vector<2x32xf32>
    %79 = math.exp %78 : vector<2x32xf32>
    %cst_32 = arith.constant 1.000000e+00 : f32
    %80 = vector.broadcast %cst_32 : f32 to vector<2x32xf32>
    %81 = arith.addf %80, %79 : vector<2x32xf32>
    %82 = arith.divf %80, %81 : vector<2x32xf32>
    %83 = vector.extract_strided_slice %76 {offsets = [0, 32], sizes = [2, 32], strides = [1, 1]} : vector<2x128xf32> to vector<2x32xf32>
    %84 = arith.negf %83 : vector<2x32xf32>
    %85 = math.exp %84 : vector<2x32xf32>
    %cst_33 = arith.constant 1.000000e+00 : f32
    %86 = vector.broadcast %cst_33 : f32 to vector<2x32xf32>
    %87 = arith.addf %86, %85 : vector<2x32xf32>
    %88 = arith.divf %86, %87 : vector<2x32xf32>
    %89 = vector.extract_strided_slice %76 {offsets = [0, 64], sizes = [2, 32], strides = [1, 1]} : vector<2x128xf32> to vector<2x32xf32>
    %90 = math.tanh %89 : vector<2x32xf32>
    %91 = vector.extract_strided_slice %76 {offsets = [0, 96], sizes = [2, 32], strides = [1, 1]} : vector<2x128xf32> to vector<2x32xf32>
    %92 = arith.negf %91 : vector<2x32xf32>
    %93 = math.exp %92 : vector<2x32xf32>
    %cst_34 = arith.constant 1.000000e+00 : f32
    %94 = vector.broadcast %cst_34 : f32 to vector<2x32xf32>
    %95 = arith.addf %94, %93 : vector<2x32xf32>
    %96 = arith.divf %94, %95 : vector<2x32xf32>
    %97 = arith.mulf %88, %42 : vector<2x32xf32>
    %98 = arith.mulf %82, %90 : vector<2x32xf32>
    %99 = arith.addf %97, %98 : vector<2x32xf32>
    %100 = math.tanh %99 : vector<2x32xf32>
    %101 = arith.mulf %96, %100 : vector<2x32xf32>
    %102 = tpu.concatenate %101, %73 in 1 : vector<2x32xf32>, vector<2x32xf32> -> vector<2x64xf32>
    %cst_35 = arith.constant dense<0.000000e+00> : vector<2x128xf32>
    %103 = tpu.matmul %102, %4, %cst_35 {dimension_numbers = #tpu.dot_dimension_numbers<[1], [0], [0], [1], [0, 0, 1, 1], [], []>} : vector<2x64xf32>, vector<64x128xf32>, vector<2x128xf32> -> vector<2x128xf32>
    %104 = vector.broadcast %5 : vector<1x128xf32> to vector<2x128xf32>
    %105 = arith.addf %103, %104 : vector<2x128xf32>
    %106 = vector.extract_strided_slice %105 {offsets = [0, 0], sizes = [2, 32], strides = [1, 1]} : vector<2x128xf32> to vector<2x32xf32>
    %107 = arith.negf %106 : vector<2x32xf32>
    %108 = math.exp %107 : vector<2x32xf32>
    %cst_36 = arith.constant 1.000000e+00 : f32
    %109 = vector.broadcast %cst_36 : f32 to vector<2x32xf32>
    %110 = arith.addf %109, %108 : vector<2x32xf32>
    %111 = arith.divf %109, %110 : vector<2x32xf32>
    %112 = vector.extract_strided_slice %105 {offsets = [0, 32], sizes = [2, 32], strides = [1, 1]} : vector<2x128xf32> to vector<2x32xf32>
    %113 = arith.negf %112 : vector<2x32xf32>
    %114 = math.exp %113 : vector<2x32xf32>
    %cst_37 = arith.constant 1.000000e+00 : f32
    %115 = vector.broadcast %cst_37 : f32 to vector<2x32xf32>
    %116 = arith.addf %115, %114 : vector<2x32xf32>
    %117 = arith.divf %115, %116 : vector<2x32xf32>
    %118 = vector.extract_strided_slice %105 {offsets = [0, 64], sizes = [2, 32], strides = [1, 1]} : vector<2x128xf32> to vector<2x32xf32>
    %119 = math.tanh %118 : vector<2x32xf32>
    %120 = vector.extract_strided_slice %105 {offsets = [0, 96], sizes = [2, 32], strides = [1, 1]} : vector<2x128xf32> to vector<2x32xf32>
    %121 = arith.negf %120 : vector<2x32xf32>
    %122 = math.exp %121 : vector<2x32xf32>
    %cst_38 = arith.constant 1.000000e+00 : f32
    %123 = vector.broadcast %cst_38 : f32 to vector<2x32xf32>
    %124 = arith.addf %123, %122 : vector<2x32xf32>
    %125 = arith.divf %123, %124 : vector<2x32xf32>
    %126 = arith.mulf %117, %71 : vector<2x32xf32>
    %127 = arith.mulf %111, %119 : vector<2x32xf32>
    %128 = arith.addf %126, %127 : vector<2x32xf32>
    %129 = math.tanh %128 : vector<2x32xf32>
    %130 = arith.mulf %125, %129 : vector<2x32xf32>
    %131 = vector.extract_strided_slice %12 {offsets = [4, 0], sizes = [2, 128], strides = [1, 1]} : vector<16x128xf32> to vector<2x128xf32>
    %cst_39 = arith.constant dense<0.000000e+00> : vector<2x128xf32>
    %132 = tpu.matmul %101, %2, %cst_39 {dimension_numbers = #tpu.dot_dimension_numbers<[1], [0], [0], [1], [0, 0, 1, 1], [], []>} : vector<2x32xf32>, vector<32x128xf32>, vector<2x128xf32> -> vector<2x128xf32>
    %133 = arith.addf %131, %132 : vector<2x128xf32>
    %134 = vector.extract_strided_slice %133 {offsets = [0, 0], sizes = [2, 32], strides = [1, 1]} : vector<2x128xf32> to vector<2x32xf32>
    %135 = arith.negf %134 : vector<2x32xf32>
    %136 = math.exp %135 : vector<2x32xf32>
    %cst_40 = arith.constant 1.000000e+00 : f32
    %137 = vector.broadcast %cst_40 : f32 to vector<2x32xf32>
    %138 = arith.addf %137, %136 : vector<2x32xf32>
    %139 = arith.divf %137, %138 : vector<2x32xf32>
    %140 = vector.extract_strided_slice %133 {offsets = [0, 32], sizes = [2, 32], strides = [1, 1]} : vector<2x128xf32> to vector<2x32xf32>
    %141 = arith.negf %140 : vector<2x32xf32>
    %142 = math.exp %141 : vector<2x32xf32>
    %cst_41 = arith.constant 1.000000e+00 : f32
    %143 = vector.broadcast %cst_41 : f32 to vector<2x32xf32>
    %144 = arith.addf %143, %142 : vector<2x32xf32>
    %145 = arith.divf %143, %144 : vector<2x32xf32>
    %146 = vector.extract_strided_slice %133 {offsets = [0, 64], sizes = [2, 32], strides = [1, 1]} : vector<2x128xf32> to vector<2x32xf32>
    %147 = math.tanh %146 : vector<2x32xf32>
    %148 = vector.extract_strided_slice %133 {offsets = [0, 96], sizes = [2, 32], strides = [1, 1]} : vector<2x128xf32> to vector<2x32xf32>
    %149 = arith.negf %148 : vector<2x32xf32>
    %150 = math.exp %149 : vector<2x32xf32>
    %cst_42 = arith.constant 1.000000e+00 : f32
    %151 = vector.broadcast %cst_42 : f32 to vector<2x32xf32>
    %152 = arith.addf %151, %150 : vector<2x32xf32>
    %153 = arith.divf %151, %152 : vector<2x32xf32>
    %154 = arith.mulf %145, %99 : vector<2x32xf32>
    %155 = arith.mulf %139, %147 : vector<2x32xf32>
    %156 = arith.addf %154, %155 : vector<2x32xf32>
    %157 = math.tanh %156 : vector<2x32xf32>
    %158 = arith.mulf %153, %157 : vector<2x32xf32>
    %159 = tpu.concatenate %158, %130 in 1 : vector<2x32xf32>, vector<2x32xf32> -> vector<2x64xf32>
    %cst_43 = arith.constant dense<0.000000e+00> : vector<2x128xf32>
    %160 = tpu.matmul %159, %4, %cst_43 {dimension_numbers = #tpu.dot_dimension_numbers<[1], [0], [0], [1], [0, 0, 1, 1], [], []>} : vector<2x64xf32>, vector<64x128xf32>, vector<2x128xf32> -> vector<2x128xf32>
    %161 = vector.broadcast %5 : vector<1x128xf32> to vector<2x128xf32>
    %162 = arith.addf %160, %161 : vector<2x128xf32>
    %163 = vector.extract_strided_slice %162 {offsets = [0, 0], sizes = [2, 32], strides = [1, 1]} : vector<2x128xf32> to vector<2x32xf32>
    %164 = arith.negf %163 : vector<2x32xf32>
    %165 = math.exp %164 : vector<2x32xf32>
    %cst_44 = arith.constant 1.000000e+00 : f32
    %166 = vector.broadcast %cst_44 : f32 to vector<2x32xf32>
    %167 = arith.addf %166, %165 : vector<2x32xf32>
    %168 = arith.divf %166, %167 : vector<2x32xf32>
    %169 = vector.extract_strided_slice %162 {offsets = [0, 32], sizes = [2, 32], strides = [1, 1]} : vector<2x128xf32> to vector<2x32xf32>
    %170 = arith.negf %169 : vector<2x32xf32>
    %171 = math.exp %170 : vector<2x32xf32>
    %cst_45 = arith.constant 1.000000e+00 : f32
    %172 = vector.broadcast %cst_45 : f32 to vector<2x32xf32>
    %173 = arith.addf %172, %171 : vector<2x32xf32>
    %174 = arith.divf %172, %173 : vector<2x32xf32>
    %175 = vector.extract_strided_slice %162 {offsets = [0, 64], sizes = [2, 32], strides = [1, 1]} : vector<2x128xf32> to vector<2x32xf32>
    %176 = math.tanh %175 : vector<2x32xf32>
    %177 = vector.extract_strided_slice %162 {offsets = [0, 96], sizes = [2, 32], strides = [1, 1]} : vector<2x128xf32> to vector<2x32xf32>
    %178 = arith.negf %177 : vector<2x32xf32>
    %179 = math.exp %178 : vector<2x32xf32>
    %cst_46 = arith.constant 1.000000e+00 : f32
    %180 = vector.broadcast %cst_46 : f32 to vector<2x32xf32>
    %181 = arith.addf %180, %179 : vector<2x32xf32>
    %182 = arith.divf %180, %181 : vector<2x32xf32>
    %183 = arith.mulf %174, %128 : vector<2x32xf32>
    %184 = arith.mulf %168, %176 : vector<2x32xf32>
    %185 = arith.addf %183, %184 : vector<2x32xf32>
    %186 = math.tanh %185 : vector<2x32xf32>
    %187 = arith.mulf %182, %186 : vector<2x32xf32>
    %188 = vector.extract_strided_slice %12 {offsets = [6, 0], sizes = [2, 128], strides = [1, 1]} : vector<16x128xf32> to vector<2x128xf32>
    %cst_47 = arith.constant dense<0.000000e+00> : vector<2x128xf32>
    %189 = tpu.matmul %158, %2, %cst_47 {dimension_numbers = #tpu.dot_dimension_numbers<[1], [0], [0], [1], [0, 0, 1, 1], [], []>} : vector<2x32xf32>, vector<32x128xf32>, vector<2x128xf32> -> vector<2x128xf32>
    %190 = arith.addf %188, %189 : vector<2x128xf32>
    %191 = vector.extract_strided_slice %190 {offsets = [0, 0], sizes = [2, 32], strides = [1, 1]} : vector<2x128xf32> to vector<2x32xf32>
    %192 = arith.negf %191 : vector<2x32xf32>
    %193 = math.exp %192 : vector<2x32xf32>
    %cst_48 = arith.constant 1.000000e+00 : f32
    %194 = vector.broadcast %cst_48 : f32 to vector<2x32xf32>
    %195 = arith.addf %194, %193 : vector<2x32xf32>
    %196 = arith.divf %194, %195 : vector<2x32xf32>
    %197 = vector.extract_strided_slice %190 {offsets = [0, 32], sizes = [2, 32], strides = [1, 1]} : vector<2x128xf32> to vector<2x32xf32>
    %198 = arith.negf %197 : vector<2x32xf32>
    %199 = math.exp %198 : vector<2x32xf32>
    %cst_49 = arith.constant 1.000000e+00 : f32
    %200 = vector.broadcast %cst_49 : f32 to vector<2x32xf32>
    %201 = arith.addf %200, %199 : vector<2x32xf32>
    %202 = arith.divf %200, %201 : vector<2x32xf32>
    %203 = vector.extract_strided_slice %190 {offsets = [0, 64], sizes = [2, 32], strides = [1, 1]} : vector<2x128xf32> to vector<2x32xf32>
    %204 = math.tanh %203 : vector<2x32xf32>
    %205 = vector.extract_strided_slice %190 {offsets = [0, 96], sizes = [2, 32], strides = [1, 1]} : vector<2x128xf32> to vector<2x32xf32>
    %206 = arith.negf %205 : vector<2x32xf32>
    %207 = math.exp %206 : vector<2x32xf32>
    %cst_50 = arith.constant 1.000000e+00 : f32
    %208 = vector.broadcast %cst_50 : f32 to vector<2x32xf32>
    %209 = arith.addf %208, %207 : vector<2x32xf32>
    %210 = arith.divf %208, %209 : vector<2x32xf32>
    %211 = arith.mulf %202, %156 : vector<2x32xf32>
    %212 = arith.mulf %196, %204 : vector<2x32xf32>
    %213 = arith.addf %211, %212 : vector<2x32xf32>
    %214 = math.tanh %213 : vector<2x32xf32>
    %215 = arith.mulf %210, %214 : vector<2x32xf32>
    %216 = tpu.concatenate %215, %187 in 1 : vector<2x32xf32>, vector<2x32xf32> -> vector<2x64xf32>
    %cst_51 = arith.constant dense<0.000000e+00> : vector<2x128xf32>
    %217 = tpu.matmul %216, %4, %cst_51 {dimension_numbers = #tpu.dot_dimension_numbers<[1], [0], [0], [1], [0, 0, 1, 1], [], []>} : vector<2x64xf32>, vector<64x128xf32>, vector<2x128xf32> -> vector<2x128xf32>
    %218 = vector.broadcast %5 : vector<1x128xf32> to vector<2x128xf32>
    %219 = arith.addf %217, %218 : vector<2x128xf32>
    %220 = vector.extract_strided_slice %219 {offsets = [0, 0], sizes = [2, 32], strides = [1, 1]} : vector<2x128xf32> to vector<2x32xf32>
    %221 = arith.negf %220 : vector<2x32xf32>
    %222 = math.exp %221 : vector<2x32xf32>
    %cst_52 = arith.constant 1.000000e+00 : f32
    %223 = vector.broadcast %cst_52 : f32 to vector<2x32xf32>
    %224 = arith.addf %223, %222 : vector<2x32xf32>
    %225 = arith.divf %223, %224 : vector<2x32xf32>
    %226 = vector.extract_strided_slice %219 {offsets = [0, 32], sizes = [2, 32], strides = [1, 1]} : vector<2x128xf32> to vector<2x32xf32>
    %227 = arith.negf %226 : vector<2x32xf32>
    %228 = math.exp %227 : vector<2x32xf32>
    %cst_53 = arith.constant 1.000000e+00 : f32
    %229 = vector.broadcast %cst_53 : f32 to vector<2x32xf32>
    %230 = arith.addf %229, %228 : vector<2x32xf32>
    %231 = arith.divf %229, %230 : vector<2x32xf32>
    %232 = vector.extract_strided_slice %219 {offsets = [0, 64], sizes = [2, 32], strides = [1, 1]} : vector<2x128xf32> to vector<2x32xf32>
    %233 = math.tanh %232 : vector<2x32xf32>
    %234 = vector.extract_strided_slice %219 {offsets = [0, 96], sizes = [2, 32], strides = [1, 1]} : vector<2x128xf32> to vector<2x32xf32>
    %235 = arith.negf %234 : vector<2x32xf32>
    %236 = math.exp %235 : vector<2x32xf32>
    %cst_54 = arith.constant 1.000000e+00 : f32
    %237 = vector.broadcast %cst_54 : f32 to vector<2x32xf32>
    %238 = arith.addf %237, %236 : vector<2x32xf32>
    %239 = arith.divf %237, %238 : vector<2x32xf32>
    %240 = arith.mulf %231, %185 : vector<2x32xf32>
    %241 = arith.mulf %225, %233 : vector<2x32xf32>
    %242 = arith.addf %240, %241 : vector<2x32xf32>
    %243 = math.tanh %242 : vector<2x32xf32>
    %244 = arith.mulf %239, %243 : vector<2x32xf32>
    %245 = vector.extract_strided_slice %12 {offsets = [8, 0], sizes = [2, 128], strides = [1, 1]} : vector<16x128xf32> to vector<2x128xf32>
    %cst_55 = arith.constant dense<0.000000e+00> : vector<2x128xf32>
    %246 = tpu.matmul %215, %2, %cst_55 {dimension_numbers = #tpu.dot_dimension_numbers<[1], [0], [0], [1], [0, 0, 1, 1], [], []>} : vector<2x32xf32>, vector<32x128xf32>, vector<2x128xf32> -> vector<2x128xf32>
    %247 = arith.addf %245, %246 : vector<2x128xf32>
    %248 = vector.extract_strided_slice %247 {offsets = [0, 0], sizes = [2, 32], strides = [1, 1]} : vector<2x128xf32> to vector<2x32xf32>
    %249 = arith.negf %248 : vector<2x32xf32>
    %250 = math.exp %249 : vector<2x32xf32>
    %cst_56 = arith.constant 1.000000e+00 : f32
    %251 = vector.broadcast %cst_56 : f32 to vector<2x32xf32>
    %252 = arith.addf %251, %250 : vector<2x32xf32>
    %253 = arith.divf %251, %252 : vector<2x32xf32>
    %254 = vector.extract_strided_slice %247 {offsets = [0, 32], sizes = [2, 32], strides = [1, 1]} : vector<2x128xf32> to vector<2x32xf32>
    %255 = arith.negf %254 : vector<2x32xf32>
    %256 = math.exp %255 : vector<2x32xf32>
    %cst_57 = arith.constant 1.000000e+00 : f32
    %257 = vector.broadcast %cst_57 : f32 to vector<2x32xf32>
    %258 = arith.addf %257, %256 : vector<2x32xf32>
    %259 = arith.divf %257, %258 : vector<2x32xf32>
    %260 = vector.extract_strided_slice %247 {offsets = [0, 64], sizes = [2, 32], strides = [1, 1]} : vector<2x128xf32> to vector<2x32xf32>
    %261 = math.tanh %260 : vector<2x32xf32>
    %262 = vector.extract_strided_slice %247 {offsets = [0, 96], sizes = [2, 32], strides = [1, 1]} : vector<2x128xf32> to vector<2x32xf32>
    %263 = arith.negf %262 : vector<2x32xf32>
    %264 = math.exp %263 : vector<2x32xf32>
    %cst_58 = arith.constant 1.000000e+00 : f32
    %265 = vector.broadcast %cst_58 : f32 to vector<2x32xf32>
    %266 = arith.addf %265, %264 : vector<2x32xf32>
    %267 = arith.divf %265, %266 : vector<2x32xf32>
    %268 = arith.mulf %259, %213 : vector<2x32xf32>
    %269 = arith.mulf %253, %261 : vector<2x32xf32>
    %270 = arith.addf %268, %269 : vector<2x32xf32>
    %271 = math.tanh %270 : vector<2x32xf32>
    %272 = arith.mulf %267, %271 : vector<2x32xf32>
    %273 = tpu.concatenate %272, %244 in 1 : vector<2x32xf32>, vector<2x32xf32> -> vector<2x64xf32>
    %cst_59 = arith.constant dense<0.000000e+00> : vector<2x128xf32>
    %274 = tpu.matmul %273, %4, %cst_59 {dimension_numbers = #tpu.dot_dimension_numbers<[1], [0], [0], [1], [0, 0, 1, 1], [], []>} : vector<2x64xf32>, vector<64x128xf32>, vector<2x128xf32> -> vector<2x128xf32>
    %275 = vector.broadcast %5 : vector<1x128xf32> to vector<2x128xf32>
    %276 = arith.addf %274, %275 : vector<2x128xf32>
    %277 = vector.extract_strided_slice %276 {offsets = [0, 0], sizes = [2, 32], strides = [1, 1]} : vector<2x128xf32> to vector<2x32xf32>
    %278 = arith.negf %277 : vector<2x32xf32>
    %279 = math.exp %278 : vector<2x32xf32>
    %cst_60 = arith.constant 1.000000e+00 : f32
    %280 = vector.broadcast %cst_60 : f32 to vector<2x32xf32>
    %281 = arith.addf %280, %279 : vector<2x32xf32>
    %282 = arith.divf %280, %281 : vector<2x32xf32>
    %283 = vector.extract_strided_slice %276 {offsets = [0, 32], sizes = [2, 32], strides = [1, 1]} : vector<2x128xf32> to vector<2x32xf32>
    %284 = arith.negf %283 : vector<2x32xf32>
    %285 = math.exp %284 : vector<2x32xf32>
    %cst_61 = arith.constant 1.000000e+00 : f32
    %286 = vector.broadcast %cst_61 : f32 to vector<2x32xf32>
    %287 = arith.addf %286, %285 : vector<2x32xf32>
    %288 = arith.divf %286, %287 : vector<2x32xf32>
    %289 = vector.extract_strided_slice %276 {offsets = [0, 64], sizes = [2, 32], strides = [1, 1]} : vector<2x128xf32> to vector<2x32xf32>
    %290 = math.tanh %289 : vector<2x32xf32>
    %291 = vector.extract_strided_slice %276 {offsets = [0, 96], sizes = [2, 32], strides = [1, 1]} : vector<2x128xf32> to vector<2x32xf32>
    %292 = arith.negf %291 : vector<2x32xf32>
    %293 = math.exp %292 : vector<2x32xf32>
    %cst_62 = arith.constant 1.000000e+00 : f32
    %294 = vector.broadcast %cst_62 : f32 to vector<2x32xf32>
    %295 = arith.addf %294, %293 : vector<2x32xf32>
    %296 = arith.divf %294, %295 : vector<2x32xf32>
    %297 = arith.mulf %288, %242 : vector<2x32xf32>
    %298 = arith.mulf %282, %290 : vector<2x32xf32>
    %299 = arith.addf %297, %298 : vector<2x32xf32>
    %300 = math.tanh %299 : vector<2x32xf32>
    %301 = arith.mulf %296, %300 : vector<2x32xf32>
    %302 = vector.extract_strided_slice %12 {offsets = [10, 0], sizes = [2, 128], strides = [1, 1]} : vector<16x128xf32> to vector<2x128xf32>
    %cst_63 = arith.constant dense<0.000000e+00> : vector<2x128xf32>
    %303 = tpu.matmul %272, %2, %cst_63 {dimension_numbers = #tpu.dot_dimension_numbers<[1], [0], [0], [1], [0, 0, 1, 1], [], []>} : vector<2x32xf32>, vector<32x128xf32>, vector<2x128xf32> -> vector<2x128xf32>
    %304 = arith.addf %302, %303 : vector<2x128xf32>
    %305 = vector.extract_strided_slice %304 {offsets = [0, 0], sizes = [2, 32], strides = [1, 1]} : vector<2x128xf32> to vector<2x32xf32>
    %306 = arith.negf %305 : vector<2x32xf32>
    %307 = math.exp %306 : vector<2x32xf32>
    %cst_64 = arith.constant 1.000000e+00 : f32
    %308 = vector.broadcast %cst_64 : f32 to vector<2x32xf32>
    %309 = arith.addf %308, %307 : vector<2x32xf32>
    %310 = arith.divf %308, %309 : vector<2x32xf32>
    %311 = vector.extract_strided_slice %304 {offsets = [0, 32], sizes = [2, 32], strides = [1, 1]} : vector<2x128xf32> to vector<2x32xf32>
    %312 = arith.negf %311 : vector<2x32xf32>
    %313 = math.exp %312 : vector<2x32xf32>
    %cst_65 = arith.constant 1.000000e+00 : f32
    %314 = vector.broadcast %cst_65 : f32 to vector<2x32xf32>
    %315 = arith.addf %314, %313 : vector<2x32xf32>
    %316 = arith.divf %314, %315 : vector<2x32xf32>
    %317 = vector.extract_strided_slice %304 {offsets = [0, 64], sizes = [2, 32], strides = [1, 1]} : vector<2x128xf32> to vector<2x32xf32>
    %318 = math.tanh %317 : vector<2x32xf32>
    %319 = vector.extract_strided_slice %304 {offsets = [0, 96], sizes = [2, 32], strides = [1, 1]} : vector<2x128xf32> to vector<2x32xf32>
    %320 = arith.negf %319 : vector<2x32xf32>
    %321 = math.exp %320 : vector<2x32xf32>
    %cst_66 = arith.constant 1.000000e+00 : f32
    %322 = vector.broadcast %cst_66 : f32 to vector<2x32xf32>
    %323 = arith.addf %322, %321 : vector<2x32xf32>
    %324 = arith.divf %322, %323 : vector<2x32xf32>
    %325 = arith.mulf %316, %270 : vector<2x32xf32>
    %326 = arith.mulf %310, %318 : vector<2x32xf32>
    %327 = arith.addf %325, %326 : vector<2x32xf32>
    %328 = math.tanh %327 : vector<2x32xf32>
    %329 = arith.mulf %324, %328 : vector<2x32xf32>
    %330 = tpu.concatenate %329, %301 in 1 : vector<2x32xf32>, vector<2x32xf32> -> vector<2x64xf32>
    %cst_67 = arith.constant dense<0.000000e+00> : vector<2x128xf32>
    %331 = tpu.matmul %330, %4, %cst_67 {dimension_numbers = #tpu.dot_dimension_numbers<[1], [0], [0], [1], [0, 0, 1, 1], [], []>} : vector<2x64xf32>, vector<64x128xf32>, vector<2x128xf32> -> vector<2x128xf32>
    %332 = vector.broadcast %5 : vector<1x128xf32> to vector<2x128xf32>
    %333 = arith.addf %331, %332 : vector<2x128xf32>
    %334 = vector.extract_strided_slice %333 {offsets = [0, 0], sizes = [2, 32], strides = [1, 1]} : vector<2x128xf32> to vector<2x32xf32>
    %335 = arith.negf %334 : vector<2x32xf32>
    %336 = math.exp %335 : vector<2x32xf32>
    %cst_68 = arith.constant 1.000000e+00 : f32
    %337 = vector.broadcast %cst_68 : f32 to vector<2x32xf32>
    %338 = arith.addf %337, %336 : vector<2x32xf32>
    %339 = arith.divf %337, %338 : vector<2x32xf32>
    %340 = vector.extract_strided_slice %333 {offsets = [0, 32], sizes = [2, 32], strides = [1, 1]} : vector<2x128xf32> to vector<2x32xf32>
    %341 = arith.negf %340 : vector<2x32xf32>
    %342 = math.exp %341 : vector<2x32xf32>
    %cst_69 = arith.constant 1.000000e+00 : f32
    %343 = vector.broadcast %cst_69 : f32 to vector<2x32xf32>
    %344 = arith.addf %343, %342 : vector<2x32xf32>
    %345 = arith.divf %343, %344 : vector<2x32xf32>
    %346 = vector.extract_strided_slice %333 {offsets = [0, 64], sizes = [2, 32], strides = [1, 1]} : vector<2x128xf32> to vector<2x32xf32>
    %347 = math.tanh %346 : vector<2x32xf32>
    %348 = vector.extract_strided_slice %333 {offsets = [0, 96], sizes = [2, 32], strides = [1, 1]} : vector<2x128xf32> to vector<2x32xf32>
    %349 = arith.negf %348 : vector<2x32xf32>
    %350 = math.exp %349 : vector<2x32xf32>
    %cst_70 = arith.constant 1.000000e+00 : f32
    %351 = vector.broadcast %cst_70 : f32 to vector<2x32xf32>
    %352 = arith.addf %351, %350 : vector<2x32xf32>
    %353 = arith.divf %351, %352 : vector<2x32xf32>
    %354 = arith.mulf %345, %299 : vector<2x32xf32>
    %355 = arith.mulf %339, %347 : vector<2x32xf32>
    %356 = arith.addf %354, %355 : vector<2x32xf32>
    %357 = math.tanh %356 : vector<2x32xf32>
    %358 = arith.mulf %353, %357 : vector<2x32xf32>
    %359 = vector.extract_strided_slice %12 {offsets = [12, 0], sizes = [2, 128], strides = [1, 1]} : vector<16x128xf32> to vector<2x128xf32>
    %cst_71 = arith.constant dense<0.000000e+00> : vector<2x128xf32>
    %360 = tpu.matmul %329, %2, %cst_71 {dimension_numbers = #tpu.dot_dimension_numbers<[1], [0], [0], [1], [0, 0, 1, 1], [], []>} : vector<2x32xf32>, vector<32x128xf32>, vector<2x128xf32> -> vector<2x128xf32>
    %361 = arith.addf %359, %360 : vector<2x128xf32>
    %362 = vector.extract_strided_slice %361 {offsets = [0, 0], sizes = [2, 32], strides = [1, 1]} : vector<2x128xf32> to vector<2x32xf32>
    %363 = arith.negf %362 : vector<2x32xf32>
    %364 = math.exp %363 : vector<2x32xf32>
    %cst_72 = arith.constant 1.000000e+00 : f32
    %365 = vector.broadcast %cst_72 : f32 to vector<2x32xf32>
    %366 = arith.addf %365, %364 : vector<2x32xf32>
    %367 = arith.divf %365, %366 : vector<2x32xf32>
    %368 = vector.extract_strided_slice %361 {offsets = [0, 32], sizes = [2, 32], strides = [1, 1]} : vector<2x128xf32> to vector<2x32xf32>
    %369 = arith.negf %368 : vector<2x32xf32>
    %370 = math.exp %369 : vector<2x32xf32>
    %cst_73 = arith.constant 1.000000e+00 : f32
    %371 = vector.broadcast %cst_73 : f32 to vector<2x32xf32>
    %372 = arith.addf %371, %370 : vector<2x32xf32>
    %373 = arith.divf %371, %372 : vector<2x32xf32>
    %374 = vector.extract_strided_slice %361 {offsets = [0, 64], sizes = [2, 32], strides = [1, 1]} : vector<2x128xf32> to vector<2x32xf32>
    %375 = math.tanh %374 : vector<2x32xf32>
    %376 = vector.extract_strided_slice %361 {offsets = [0, 96], sizes = [2, 32], strides = [1, 1]} : vector<2x128xf32> to vector<2x32xf32>
    %377 = arith.negf %376 : vector<2x32xf32>
    %378 = math.exp %377 : vector<2x32xf32>
    %cst_74 = arith.constant 1.000000e+00 : f32
    %379 = vector.broadcast %cst_74 : f32 to vector<2x32xf32>
    %380 = arith.addf %379, %378 : vector<2x32xf32>
    %381 = arith.divf %379, %380 : vector<2x32xf32>
    %382 = arith.mulf %373, %327 : vector<2x32xf32>
    %383 = arith.mulf %367, %375 : vector<2x32xf32>
    %384 = arith.addf %382, %383 : vector<2x32xf32>
    %385 = math.tanh %384 : vector<2x32xf32>
    %386 = arith.mulf %381, %385 : vector<2x32xf32>
    %387 = tpu.concatenate %386, %358 in 1 : vector<2x32xf32>, vector<2x32xf32> -> vector<2x64xf32>
    %cst_75 = arith.constant dense<0.000000e+00> : vector<2x128xf32>
    %388 = tpu.matmul %387, %4, %cst_75 {dimension_numbers = #tpu.dot_dimension_numbers<[1], [0], [0], [1], [0, 0, 1, 1], [], []>} : vector<2x64xf32>, vector<64x128xf32>, vector<2x128xf32> -> vector<2x128xf32>
    %389 = vector.broadcast %5 : vector<1x128xf32> to vector<2x128xf32>
    %390 = arith.addf %388, %389 : vector<2x128xf32>
    %391 = vector.extract_strided_slice %390 {offsets = [0, 0], sizes = [2, 32], strides = [1, 1]} : vector<2x128xf32> to vector<2x32xf32>
    %392 = arith.negf %391 : vector<2x32xf32>
    %393 = math.exp %392 : vector<2x32xf32>
    %cst_76 = arith.constant 1.000000e+00 : f32
    %394 = vector.broadcast %cst_76 : f32 to vector<2x32xf32>
    %395 = arith.addf %394, %393 : vector<2x32xf32>
    %396 = arith.divf %394, %395 : vector<2x32xf32>
    %397 = vector.extract_strided_slice %390 {offsets = [0, 32], sizes = [2, 32], strides = [1, 1]} : vector<2x128xf32> to vector<2x32xf32>
    %398 = arith.negf %397 : vector<2x32xf32>
    %399 = math.exp %398 : vector<2x32xf32>
    %cst_77 = arith.constant 1.000000e+00 : f32
    %400 = vector.broadcast %cst_77 : f32 to vector<2x32xf32>
    %401 = arith.addf %400, %399 : vector<2x32xf32>
    %402 = arith.divf %400, %401 : vector<2x32xf32>
    %403 = vector.extract_strided_slice %390 {offsets = [0, 64], sizes = [2, 32], strides = [1, 1]} : vector<2x128xf32> to vector<2x32xf32>
    %404 = math.tanh %403 : vector<2x32xf32>
    %405 = vector.extract_strided_slice %390 {offsets = [0, 96], sizes = [2, 32], strides = [1, 1]} : vector<2x128xf32> to vector<2x32xf32>
    %406 = arith.negf %405 : vector<2x32xf32>
    %407 = math.exp %406 : vector<2x32xf32>
    %cst_78 = arith.constant 1.000000e+00 : f32
    %408 = vector.broadcast %cst_78 : f32 to vector<2x32xf32>
    %409 = arith.addf %408, %407 : vector<2x32xf32>
    %410 = arith.divf %408, %409 : vector<2x32xf32>
    %411 = arith.mulf %402, %356 : vector<2x32xf32>
    %412 = arith.mulf %396, %404 : vector<2x32xf32>
    %413 = arith.addf %411, %412 : vector<2x32xf32>
    %414 = math.tanh %413 : vector<2x32xf32>
    %415 = arith.mulf %410, %414 : vector<2x32xf32>
    %416 = vector.extract_strided_slice %12 {offsets = [14, 0], sizes = [2, 128], strides = [1, 1]} : vector<16x128xf32> to vector<2x128xf32>
    %cst_79 = arith.constant dense<0.000000e+00> : vector<2x128xf32>
    %417 = tpu.matmul %386, %2, %cst_79 {dimension_numbers = #tpu.dot_dimension_numbers<[1], [0], [0], [1], [0, 0, 1, 1], [], []>} : vector<2x32xf32>, vector<32x128xf32>, vector<2x128xf32> -> vector<2x128xf32>
    %418 = arith.addf %416, %417 : vector<2x128xf32>
    %419 = vector.extract_strided_slice %418 {offsets = [0, 0], sizes = [2, 32], strides = [1, 1]} : vector<2x128xf32> to vector<2x32xf32>
    %420 = arith.negf %419 : vector<2x32xf32>
    %421 = math.exp %420 : vector<2x32xf32>
    %cst_80 = arith.constant 1.000000e+00 : f32
    %422 = vector.broadcast %cst_80 : f32 to vector<2x32xf32>
    %423 = arith.addf %422, %421 : vector<2x32xf32>
    %424 = arith.divf %422, %423 : vector<2x32xf32>
    %425 = vector.extract_strided_slice %418 {offsets = [0, 32], sizes = [2, 32], strides = [1, 1]} : vector<2x128xf32> to vector<2x32xf32>
    %426 = arith.negf %425 : vector<2x32xf32>
    %427 = math.exp %426 : vector<2x32xf32>
    %cst_81 = arith.constant 1.000000e+00 : f32
    %428 = vector.broadcast %cst_81 : f32 to vector<2x32xf32>
    %429 = arith.addf %428, %427 : vector<2x32xf32>
    %430 = arith.divf %428, %429 : vector<2x32xf32>
    %431 = vector.extract_strided_slice %418 {offsets = [0, 64], sizes = [2, 32], strides = [1, 1]} : vector<2x128xf32> to vector<2x32xf32>
    %432 = math.tanh %431 : vector<2x32xf32>
    %433 = vector.extract_strided_slice %418 {offsets = [0, 96], sizes = [2, 32], strides = [1, 1]} : vector<2x128xf32> to vector<2x32xf32>
    %434 = arith.negf %433 : vector<2x32xf32>
    %435 = math.exp %434 : vector<2x32xf32>
    %cst_82 = arith.constant 1.000000e+00 : f32
    %436 = vector.broadcast %cst_82 : f32 to vector<2x32xf32>
    %437 = arith.addf %436, %435 : vector<2x32xf32>
    %438 = arith.divf %436, %437 : vector<2x32xf32>
    %439 = arith.mulf %430, %384 : vector<2x32xf32>
    %440 = arith.mulf %424, %432 : vector<2x32xf32>
    %441 = arith.addf %439, %440 : vector<2x32xf32>
    %442 = math.tanh %441 : vector<2x32xf32>
    %443 = arith.mulf %438, %442 : vector<2x32xf32>
    %444 = tpu.concatenate %443, %415 in 1 : vector<2x32xf32>, vector<2x32xf32> -> vector<2x64xf32>
    %cst_83 = arith.constant dense<0.000000e+00> : vector<2x128xf32>
    %445 = tpu.matmul %444, %4, %cst_83 {dimension_numbers = #tpu.dot_dimension_numbers<[1], [0], [0], [1], [0, 0, 1, 1], [], []>} : vector<2x64xf32>, vector<64x128xf32>, vector<2x128xf32> -> vector<2x128xf32>
    %446 = vector.broadcast %5 : vector<1x128xf32> to vector<2x128xf32>
    %447 = arith.addf %445, %446 : vector<2x128xf32>
    %448 = vector.extract_strided_slice %447 {offsets = [0, 0], sizes = [2, 32], strides = [1, 1]} : vector<2x128xf32> to vector<2x32xf32>
    %449 = arith.negf %448 : vector<2x32xf32>
    %450 = math.exp %449 : vector<2x32xf32>
    %cst_84 = arith.constant 1.000000e+00 : f32
    %451 = vector.broadcast %cst_84 : f32 to vector<2x32xf32>
    %452 = arith.addf %451, %450 : vector<2x32xf32>
    %453 = arith.divf %451, %452 : vector<2x32xf32>
    %454 = vector.extract_strided_slice %447 {offsets = [0, 32], sizes = [2, 32], strides = [1, 1]} : vector<2x128xf32> to vector<2x32xf32>
    %455 = arith.negf %454 : vector<2x32xf32>
    %456 = math.exp %455 : vector<2x32xf32>
    %cst_85 = arith.constant 1.000000e+00 : f32
    %457 = vector.broadcast %cst_85 : f32 to vector<2x32xf32>
    %458 = arith.addf %457, %456 : vector<2x32xf32>
    %459 = arith.divf %457, %458 : vector<2x32xf32>
    %460 = vector.extract_strided_slice %447 {offsets = [0, 64], sizes = [2, 32], strides = [1, 1]} : vector<2x128xf32> to vector<2x32xf32>
    %461 = math.tanh %460 : vector<2x32xf32>
    %462 = vector.extract_strided_slice %447 {offsets = [0, 96], sizes = [2, 32], strides = [1, 1]} : vector<2x128xf32> to vector<2x32xf32>
    %463 = arith.negf %462 : vector<2x32xf32>
    %464 = math.exp %463 : vector<2x32xf32>
    %cst_86 = arith.constant 1.000000e+00 : f32
    %465 = vector.broadcast %cst_86 : f32 to vector<2x32xf32>
    %466 = arith.addf %465, %464 : vector<2x32xf32>
    %467 = arith.divf %465, %466 : vector<2x32xf32>
    %468 = arith.mulf %459, %413 : vector<2x32xf32>
    %469 = arith.mulf %453, %461 : vector<2x32xf32>
    %470 = arith.addf %468, %469 : vector<2x32xf32>
    %471 = math.tanh %470 : vector<2x32xf32>
    %472 = arith.mulf %467, %471 : vector<2x32xf32>
    %cst_87 = arith.constant dense<0.000000e+00> : vector<2x64xf32>
    %473 = tpu.matmul %472, %6, %cst_87 {dimension_numbers = #tpu.dot_dimension_numbers<[1], [0], [0], [1], [0, 0, 1, 1], [], []>} : vector<2x32xf32>, vector<32x64xf32>, vector<2x64xf32> -> vector<2x64xf32>
    %474 = vector.broadcast %7 : vector<1x64xf32> to vector<2x64xf32>
    %475 = arith.addf %473, %474 : vector<2x64xf32>
    %cst_88 = arith.constant dense<0.000000e+00> : vector<2x1xf32>
    %476 = tpu.matmul %475, %8, %cst_88 {dimension_numbers = #tpu.dot_dimension_numbers<[1], [0], [0], [1], [0, 0, 1, 1], [], []>} : vector<2x64xf32>, vector<64x1xf32>, vector<2x1xf32> -> vector<2x1xf32>
    %477 = vector.broadcast %9 : vector<1x1xf32> to vector<2x1xf32>
    %478 = arith.addf %476, %477 : vector<2x1xf32>
    %479 = arith.negf %478 : vector<2x1xf32>
    %480 = math.exp %479 : vector<2x1xf32>
    %cst_89 = arith.constant 1.000000e+00 : f32
    %481 = vector.broadcast %cst_89 : f32 to vector<2x1xf32>
    %482 = arith.addf %481, %480 : vector<2x1xf32>
    %483 = arith.divf %481, %482 : vector<2x1xf32>
    %c0_90 = arith.constant 0 : index
    %c0_91 = arith.constant 0 : index
    %484 = vector.load %arg10[%c0_90, %c0_91] : memref<2x1xf32, #tpu.memory_space<vmem>>, vector<2x1xf32>
    tpu.vector_store %arg10[%c0_90, %c0_91], %483 {strides = array<i32>} : memref<2x1xf32, #tpu.memory_space<vmem>>, vector<2x1xf32>,
    return
  }
}

</mosaic_0001>

<bundles_post_ra>
// kernel: lstm_net_forward.1
= control target key start
LH: loop header
LB: loop body
LE: loop exit
PB: predicated region body
PF: predicated region fallthrough
CT: control target
= control target key end

     0   :  { %vm75_vm0 = vcmask 130048   ;;  %v2774_v3 = vmov 0.0|0.0   ;;  %vm2775_vm1 = vmmov 0   ;;  %v2776_v4 = vmov 0.0   ;;  %s2777_s28 = smov 64   ;;  %s3254_s1 = inlined_call_operand.vmem [shape: f32[16,128], index: 1, kind: input, shape index: {}]   ;;  %s3255_s0 = inlined_call_operand.vmem [shape: f32[16,16], index: 0, kind: input, shape index: {}]   ;;  %s3256_s2 = inlined_call_operand.vmem [shape: f32[32,128], index: 2, kind: input, shape index: {}]   ;;  %s3257_s3 = inlined_call_operand.vmem [shape: f32[1,128], index: 3, kind: input, shape index: {}]   ;;  %s3258_s4 = inlined_call_operand.vmem [shape: f32[64,128], index: 4, kind: input, shape index: {}]   ;;  %s3259_s5 = inlined_call_operand.vmem [shape: f32[1,128], index: 5, kind: input, shape index: {}]   ;;  %s3260_s6 = inlined_call_operand.vmem [shape: f32[32,64], index: 6, kind: input, shape index: {}]   ;;  %s3261_s8 = inlined_call_operand.vmem [shape: f32[64,1], index: 8, kind: input, shape index: {}]   ;;  %s3262_s9 = inlined_call_operand.<no memory space> [shape: f32[1,1], index: 9, kind: input, shape index: {}]   ;;  %s3263_s7 = inlined_call_operand.vmem [shape: f32[1,64], index: 7, kind: input, shape index: {}]   ;;  %s3264_s10 = inlined_call_operand.vmem [shape: f32[2,1], index: 10, kind: output, shape index: {}]  }
   0x1   :  { %v39_v0 = vld [vmem:[%s3254_s1] sm:$0xff]  ;;  %v40_v1 = vld [vmem:[%s3254_s1 + $0x8] sm:$0xff]  ;;  %2481 = vmatprep.subr.bf16.mxu0 %v2774_v3  ;;  %2228 = vmatprep.mubr.msk.f32.mxu0 %vm2775_vm1, %v2776_v4  ;;  %v43_v10 = vld [vmem:[%s3256_s2 + $0x10] sm:$0xff]  ;;  %vm157_vm2 = vcmask 261120   ;;  %vm267_vm3 = vcmask 523264   ;;  %vm2018_vm4 = vcmask 1024  }
   0x2   :  { %v37_v2 = vld [vmem:[%s3255_s0] sm:$0xff]  ;;  %v2471_v5 = vpack.c.bf16 %v40_v1, %v39_v0  ;;  %v42_v7 = vld [vmem:[%s3256_s2 + $0x8] sm:$0xff]  ;;  %v44_v11 = vld [vmem:[%s3256_s2 + $0x18] sm:$0xff] }
   0x3   :  { %2198 = vmatprep.mubr.msk.f32.mxu1 %vm75_vm0, %v37_v2  ;;  %v41_v6 = vld [vmem:[%s3256_s2] sm:$0xff]  ;;  %v38_v8 = vld [vmem:[%s3255_s0 + $0x8] sm:$0xff]  ;;  %v2867_v12 = vpack.c.bf16 %v44_v11, %v43_v10  ;;  %v48_v33 = vld [vmem:[%s3258_s4 + $0x10] sm:$0xff] }
   0x4   :  { %2472 = vmatprep.subr.bf16.mxu1 %v2471_v5  ;;  %v2856_v9 = vpack.c.bf16 %v42_v7, %v41_v6  ;;  %v2024_v13 = vld [vmem:[%s3257_s3] ss:$0 sm:$0xff]  ;;  %s2778_s3 = smov 32   ;;  %v47_v32 = vld [vmem:[%s3258_s4 + $0x8] sm:$0xff]  ;;  %v49_v35 = vld [vmem:[%s3258_s4 + $0x18] sm:$0xff] }
   0x5   :  { %2474 = vmatpush3.bf16.msra.mxu1 %v2471_v5  ;;  %v46_v31 = vld [vmem:[%s3258_s4] sm:$0xff]  ;;  %v2909_v36 = vpack.c.bf16 %v49_v35, %v48_v33  ;;  %v51_v38 = vld [vmem:[%s3258_s4 + $0x28] sm:$0xff]  ;;  %v52_v40 = vld [vmem:[%s3258_s4 + $0x30] sm:$0xff] }
   0x6   :  { %2475 = vmatprep.subr.bf16.mxu1 %v2774_v3  ;;  %v2903_v34 = vpack.c.bf16 %v47_v32, %v46_v31  ;;  %v50_v37 = vld [vmem:[%s3258_s4 + $0x20] sm:$0xff]  ;;  %v53_v41 = vld [vmem:[%s3258_s4 + $0x38] sm:$0xff] }
   0x7   :  { %v2919_v39 = vpack.c.bf16 %v51_v38, %v50_v37  ;;  %v2930_v43 = vpack.c.bf16 %v53_v41, %v52_v40  ;;  %v2958_v48 = vld [vmem:[%s3259_s5] ss:$0 sm:$0xff] }
   0x8   :  { %2199 = vmatmul.mubr.msk.f32.vlgmr.msra.gmra.mrb[0].mxu1 %vm75_vm0, %v38_v8  ;;  %2483 = vmatpush3.bf16.msra.mxu0 %v2903_v34 }
   0x9   :  { %2477 = vmatpush3.bf16.msra.mxu1 %v2856_v9  ;;  %2209 = vmatprep.mubr.msk.f32.mxu1 %vm2775_vm1, %v2776_v4 }
   0xa   :  { %2478 = vmatprep.subr.bf16.mxu1 %v2774_v3  ;;  %2484 = vmatprep.subr.bf16.mxu0 %v2774_v3 }
   0xc   :  { %2486 = vmatpush3.bf16.msra.mxu0 %v2909_v36 }
   0xd   :  { %2480 = vmatpush3.bf16.msra.mxu1 %v2867_v12  ;;  %2487 = vmatprep.subr.bf16.mxu0 %v2774_v3 }
   0xe   :  { %2493 = vmatprep.subr.bf16.mxu1 %v2774_v3 }
  0x10   :  { %2210 = vmatmul.mubr.f32.vlgmr.msra.gmra.mrb[2].mxu1 %v2776_v4  ;;  %2489 = vmatpush3.bf16.msra.mxu0 %v2919_v39 }
  0x11   :  { %2495 = vmatpush3.bf16.msra.mxu1 %v2856_v9  ;;  %2239 = vmatprep.mubr.msk.f32.mxu1 %vm2775_vm1, %v2776_v4 }
  0x12   :  { %2496 = vmatprep.subr.bf16.mxu1 %v2774_v3  ;;  %2490 = vmatprep.subr.bf16.mxu0 %v2774_v3 }
  0x14   :  { %2492 = vmatpush3.bf16.msra.mxu0 %v2930_v43 }
  0x15   :  { %2498 = vmatpush3.bf16.msra.mxu1 %v2867_v12  ;;  %2511 = vmatprep.subr.bf16.mxu0 %v2774_v3 }
  0x16   :  { %2499 = vmatprep.subr.bf16.mxu1 %v2774_v3 }
  0xdb   :  { %v2200_v14 = vpop.f32.mrb[0].mxu1 }
  0xdc   :  { %v2884_v15 = vadd.f32 %v2200_v14, %v2024_v13  ;;  %v148_v16 = vpop.f32.mrb[1].mxu1 }
  0xdd   :  { %v2886_v17 = vadd.f32 %v2024_v13, %v148_v16 }
  0xe3   :  { %v227_v18 = vpop.f32.mrb[2].mxu1 }
  0xe4   :  { %v231_v19 = vadd.f32 %v227_v18, %v2886_v17  ;;  %v2211_v20 = vpop.f32.mrb[3].mxu1 }
  0xe6   :  { %2642 = vtanh.f32 %v231_v19  ;;  %v2027_v22 = vmul.f32 -1.442695, %v231_v19 }
  0xe8   :  { %2644 = vpow2.f32 %v2027_v22 }
  0xf0   :  { %v2643_v21 = vpop.eup %2642 }
  0xf1   :  { %241 = vrot.lane.b32.xlu0 %v2643_v21, %s2777_s28 }
  0xf2   :  { %v2645_v23 = vpop.eup %2644 }
  0xf3   :  { %v235_v24 = vadd.f32 1.0, %v2645_v23 }
  0xf5   :  { %2646 = vrcp.f32 %v235_v24 }
  0xff   :  { %v2647_v25 = vpop.eup %2646 }
 0x100   :  { %v239_v28 = vmul.f32 0.0, %v2647_v25 }
 0x163   :  { %v242_v26 = vpop.permute.xlu0 %241 }
 0x164   :  { %v244_v27 = vmul.f32 %v2647_v25, %v242_v26 }
 0x166   :  { %246 = vrot.lane.b32.xlu0 %v244_v27, %s2778_s3 }
 0x1d8   :  { %v247_v29 = vpop.permute.xlu0 %246 }
 0x1d9   :  { %v2891_v30 = vadd.f32 %v247_v29, %v239_v28 }
 0x1db   :  { %2648 = vtanh.f32 %v2891_v30  ;;  %v449_v8 = vrot.slane %v2891_v30, 6 }
 0x1e5   :  { %v2649_v42 = vpop.eup %2648 }
 0x1e6   :  { %252 = vrot.lane.b32.xlu1 %v2649_v42, %s2777_s28 }
 0x258   :  { %v253_v44 = vpop.permute.xlu1 %252 }
 0x259   :  { %v255_v45 = vmul.f32 %v2647_v25, %v253_v44 }
 0x25b   :  { %257 = vrot.lane.b32.xlu1 %v255_v45, %s2778_s3 }
 0x2cd   :  { %v258_v46 = vpop.permute.xlu1 %257 }
 0x2ce   :  { %v260_v47 = vsel %vm157_vm2, %v258_v46, 0.0  ;;  %2240 = vmatmul.mubr.msk.f32.vlgmr.msra.gmra.mrb[4].mxu1 %vm157_vm2, %v258_v46 }
 0x2cf   :  { %2229 = vmatmul.mubr.msk.f32.vlgmr.msra.gmra.mrb[0].mxu0 %vm267_vm3, %v260_v47  ;;  %2501 = vmatpush3.bf16.msra.mxu1 %v2903_v34 }
 0x2d0   :  { %2502 = vmatprep.subr.bf16.mxu1 %v2774_v3  ;;  %2513 = vmatpush3.bf16.msra.mxu0 %v2856_v9 }
 0x2d1   :  { %2514 = vmatprep.subr.bf16.mxu0 %v2774_v3  ;;  %2258 = vmatprep.mubr.msk.f32.mxu1 %vm2775_vm1, %v2776_v4 }
 0x2d2   :  { %2269 = vmatprep.mubr.msk.f32.mxu0 %vm2775_vm1, %v2776_v4 }
 0x2d3   :  { %2504 = vmatpush3.bf16.msra.mxu1 %v2909_v36 }
 0x2d4   :  { %2505 = vmatprep.subr.bf16.mxu1 %v2774_v3  ;;  %2516 = vmatpush3.bf16.msra.mxu0 %v2867_v12 }
 0x2d5   :  { %2517 = vmatprep.subr.bf16.mxu0 %v2774_v3 }
 0x2d7   :  { %2507 = vmatpush3.bf16.msra.mxu1 %v2919_v39 }
 0x2d8   :  { %2508 = vmatprep.subr.bf16.mxu1 %v2774_v3 }
 0x2db   :  { %2510 = vmatpush3.bf16.msra.mxu1 %v2930_v43 }
 0x2dc   :  { %2529 = vmatprep.subr.bf16.mxu1 %v2774_v3 }
 0x3a1   :  { %v433_v49 = vpop.f32.mrb[4].mxu1 }
 0x3a2   :  { %v438_v50 = vrot.slane %v433_v49, 6  ;;  %v337_v51 = vpop.f32.mrb[0].mxu0  ;;  %v2241_v52 = vpop.f32.mrb[5].mxu1 }
 0x3a3   :  { %v338_v53 = vadd.f32 %v2958_v48, %v337_v51  ;;  %v2230_v54 = vpop.f32.mrb[1].mxu0 }
 0x3a4   :  { %v440_v55 = vadd.f32 %v438_v50, %v2886_v17 }
 0x3a5   :  { %2650 = vtanh.f32 %v338_v53  ;;  %v2030_v58 = vmul.f32 -1.442695, %v338_v53 }
 0x3a6   :  { %2652 = vtanh.f32 %v440_v55  ;;  %v2032_v59 = vmul.f32 -1.442695, %v440_v55 }
 0x3a7   :  { %2654 = vpow2.f32 %v2030_v58 }
 0x3a8   :  { %2656 = vpow2.f32 %v2032_v59 }
 0x3af   :  { %v2651_v56 = vpop.eup %2650 }
 0x3b0   :  { %v2653_v57 = vpop.eup %2652  ;;  %350 = vrot.lane.b32.xlu0 %v2651_v56, %s2777_s28 }
 0x3b1   :  { %453 = vrot.lane.b32.xlu1 %v2653_v57, %s2777_s28  ;;  %v2655_v60 = vpop.eup %2654 }
 0x3b2   :  { %v2657_v61 = vpop.eup %2656  ;;  %v344_v62 = vadd.f32 1.0, %v2655_v60 }
 0x3b3   :  { %v444_v63 = vadd.f32 1.0, %v2657_v61 }
 0x3b4   :  { %2658 = vrcp.f32 %v344_v62 }
 0x3b5   :  { %2660 = vrcp.f32 %v444_v63 }
 0x3be   :  { %v2659_v0 = vpop.eup %2658 }
 0x3bf   :  { %v2661_v2 = vpop.eup %2660  ;;  %v348_v10 = vmul.f32 0.0, %v2659_v0 }
 0x3c0   :  { %v451_v13 = vmul.f32 %v2661_v2, %v449_v8 }
 0x422   :  { %v351_v1 = vpop.permute.xlu0 %350 }
 0x423   :  { %v353_v5 = vmul.f32 %v2659_v0, %v351_v1  ;;  %v454_v6 = vpop.permute.xlu1 %453 }
 0x424   :  { %v456_v7 = vmul.f32 %v2661_v2, %v454_v6 }
 0x425   :  { %355 = vrot.lane.b32.xlu0 %v353_v5, %s2778_s3 }
 0x426   :  { %458 = vrot.lane.b32.xlu1 %v456_v7, %s2778_s3 }
 0x497   :  { %v356_v11 = vpop.permute.xlu0 %355 }
 0x498   :  { %v2967_v14 = vadd.f32 %v356_v11, %v348_v10  ;;  %v459_v16 = vpop.permute.xlu1 %458 }
 0x499   :  { %v2969_v18 = vadd.f32 %v459_v16, %v451_v13 }
 0x49a   :  { %2662 = vtanh.f32 %v2967_v14 }
 0x49b   :  { %2664 = vtanh.f32 %v2969_v18  ;;  %v663_v59 = vrot.slane %v2969_v18, 6 }
 0x4a4   :  { %v2663_v19 = vpop.eup %2662 }
 0x4a5   :  { %v2665_v20 = vpop.eup %2664  ;;  %361 = vrot.lane.b32.xlu0 %v2663_v19, %s2777_s28 }
 0x4a6   :  { %464 = vrot.lane.b32.xlu1 %v2665_v20, %s2777_s28 }
 0x517   :  { %v362_v21 = vpop.permute.xlu0 %361 }
 0x518   :  { %v364_v22 = vmul.f32 %v2659_v0, %v362_v21  ;;  %v465_v23 = vpop.permute.xlu1 %464 }
 0x519   :  { %v467_v24 = vmul.f32 %v2661_v2, %v465_v23 }
 0x51a   :  { %v473_v25 = vrot.slane %v364_v22, 6 }
 0x51b   :  { %469 = vrot.lane.b32.xlu0 %v467_v24, %s2778_s3  ;;  %v576_v26 = vrot.slane %v467_v24, 2 }
 0x51c   :  { %474 = vrot.lane.b32.xlu1 %v473_v25, %s2777_s28 }
 0x51f   :  { %577 = vrot.lane.b32.xlu0 %v576_v26, %s2778_s3 }
 0x58d   :  { %v470_v27 = vpop.permute.xlu0 %469 }
 0x58e   :  { %v475_v28 = vpop.permute.xlu1 %474 }
 0x58f   :  { %v477_v29 = vsel %vm157_vm2, %v470_v27, %v475_v28 }
 0x590   :  { %v479_v30 = vrot.slane %v477_v29, 2 }
 0x591   :  { %v578_v31 = vpop.permute.xlu0 %577 }
 0x592   :  { %2259 = vmatmul.mubr.msk.f32.vlgmr.msra.gmra.mrb[6].mxu1 %vm267_vm3, %v479_v30  ;;  %2270 = vmatmul.mubr.msk.f32.vlgmr.msra.gmra.mrb[2].mxu0 %vm157_vm2, %v578_v31 }
 0x593   :  { %2519 = vmatpush3.bf16.msra.mxu0 %v2903_v34  ;;  %2531 = vmatpush3.bf16.msra.mxu1 %v2856_v9 }
 0x594   :  { %2520 = vmatprep.subr.bf16.mxu0 %v2774_v3  ;;  %2532 = vmatprep.subr.bf16.mxu1 %v2774_v3 }
 0x595   :  { %2288 = vmatprep.mubr.msk.f32.mxu0 %vm2775_vm1, %v2776_v4  ;;  %2299 = vmatprep.mubr.msk.f32.mxu1 %vm2775_vm1, %v2776_v4 }
 0x597   :  { %2522 = vmatpush3.bf16.msra.mxu0 %v2909_v36  ;;  %2534 = vmatpush3.bf16.msra.mxu1 %v2867_v12 }
 0x598   :  { %2523 = vmatprep.subr.bf16.mxu0 %v2774_v3  ;;  %2535 = vmatprep.subr.bf16.mxu1 %v2774_v3 }
 0x59b   :  { %2525 = vmatpush3.bf16.msra.mxu0 %v2919_v39 }
 0x59c   :  { %2526 = vmatprep.subr.bf16.mxu0 %v2774_v3 }
 0x59f   :  { %2528 = vmatpush3.bf16.msra.mxu0 %v2930_v43 }
 0x5a0   :  { %2547 = vmatprep.subr.bf16.mxu0 %v2774_v3 }
 0x665   :  { %v548_v32 = vpop.f32.mrb[6].mxu1  ;;  %v647_v33 = vpop.f32.mrb[2].mxu0 }
 0x666   :  { %v549_v35 = vadd.f32 %v2958_v48, %v548_v32  ;;  %v652_v37 = vrot.slane %v647_v33, 4  ;;  %v2260_v38 = vpop.f32.mrb[7].mxu1  ;;  %v2271_v40 = vpop.f32.mrb[3].mxu0 }
 0x668   :  { %2666 = vtanh.f32 %v549_v35  ;;  %v654_v41 = vadd.f32 %v652_v37, %v2886_v17  ;;  %v2034_v45 = vmul.f32 -1.442695, %v549_v35 }
 0x66a   :  { %2668 = vtanh.f32 %v654_v41  ;;  %v2036_v46 = vmul.f32 -1.442695, %v654_v41 }
 0x66b   :  { %2670 = vpow2.f32 %v2034_v45 }
 0x66c   :  { %2672 = vpow2.f32 %v2036_v46 }
 0x672   :  { %v2667_v42 = vpop.eup %2666 }
 0x673   :  { %561 = vrot.lane.b32.xlu1 %v2667_v42, %s2777_s28 }
 0x674   :  { %v2669_v44 = vpop.eup %2668 }
 0x675   :  { %667 = vrot.lane.b32.xlu0 %v2669_v44, %s2777_s28  ;;  %v2671_v47 = vpop.eup %2670 }
 0x676   :  { %v2673_v49 = vpop.eup %2672  ;;  %v555_v50 = vadd.f32 1.0, %v2671_v47 }
 0x677   :  { %v658_v51 = vadd.f32 1.0, %v2673_v49 }
 0x678   :  { %2674 = vrcp.f32 %v555_v50 }
 0x679   :  { %2676 = vrcp.f32 %v658_v51 }
 0x682   :  { %v2675_v52 = vpop.eup %2674 }
 0x683   :  { %v2677_v55 = vpop.eup %2676  ;;  %v559_v58 = vmul.f32 %v2675_v52, %v2967_v14 }
 0x684   :  { %v665_v62 = vmul.f32 %v2677_v55, %v663_v59 }
 0x6e5   :  { %v562_v53 = vpop.permute.xlu1 %561 }
 0x6e6   :  { %v564_v54 = vmul.f32 %v2675_v52, %v562_v53 }
 0x6e7   :  { %v668_v56 = vpop.permute.xlu0 %667 }
 0x6e8   :  { %566 = vrot.lane.b32.xlu1 %v564_v54, %s2778_s3  ;;  %v670_v57 = vmul.f32 %v2677_v55, %v668_v56 }
 0x6ea   :  { %672 = vrot.lane.b32.xlu0 %v670_v57, %s2778_s3 }
 0x75a   :  { %v567_v60 = vpop.permute.xlu1 %566 }
 0x75b   :  { %v3005_v61 = vadd.f32 %v567_v60, %v559_v58 }
 0x75c   :  { %v673_v63 = vpop.permute.xlu0 %672 }
 0x75d   :  { %2678 = vtanh.f32 %v3005_v61  ;;  %v3008_v0 = vadd.f32 %v673_v63, %v665_v62 }
 0x75f   :  { %2680 = vtanh.f32 %v3008_v0  ;;  %v877_v45 = vrot.slane %v3008_v0, 6 }
 0x767   :  { %v2679_v1 = vpop.eup %2678 }
 0x768   :  { %572 = vrot.lane.b32.xlu1 %v2679_v1, %s2777_s28 }
 0x769   :  { %v2681_v2 = vpop.eup %2680 }
 0x76a   :  { %678 = vrot.lane.b32.xlu0 %v2681_v2, %s2777_s28 }
 0x7da   :  { %v573_v5 = vpop.permute.xlu1 %572 }
 0x7db   :  { %v575_v6 = vmul.f32 %v2675_v52, %v573_v5 }
 0x7dc   :  { %v679_v8 = vpop.permute.xlu0 %678 }
 0x7dd   :  { %v687_v7 = vrot.slane %v575_v6, 4  ;;  %v681_v10 = vmul.f32 %v2677_v55, %v679_v8 }
 0x7df   :  { %688 = vrot.lane.b32.xlu0 %v687_v7, %s2777_s28  ;;  %683 = vrot.lane.b32.xlu1 %v681_v10, %s2778_s3  ;;  %v790_v11 = vrot.slane %v681_v10, 4 }
 0x7e3   :  { %791 = vrot.lane.b32.xlu1 %v790_v11, %s2778_s3 }
 0x851   :  { %v689_v13 = vpop.permute.xlu0 %688  ;;  %v684_v14 = vpop.permute.xlu1 %683 }
 0x852   :  { %v691_v16 = vsel %vm157_vm2, %v684_v14, %v689_v13 }
 0x853   :  { %v693_v18 = vrot.slane %v691_v16, 4 }
 0x855   :  { %v792_v19 = vpop.permute.xlu1 %791  ;;  %2289 = vmatmul.mubr.msk.f32.vlgmr.msra.gmra.mrb[4].mxu0 %vm267_vm3, %v693_v18 }
 0x856   :  { %2300 = vmatmul.mubr.msk.f32.vlgmr.msra.gmra.mrb[8].mxu1 %vm157_vm2, %v792_v19  ;;  %2549 = vmatpush3.bf16.msra.mxu0 %v2856_v9 }
 0x857   :  { %2537 = vmatpush3.bf16.msra.mxu1 %v2903_v34  ;;  %2550 = vmatprep.subr.bf16.mxu0 %v2774_v3 }
 0x858   :  { %2538 = vmatprep.subr.bf16.mxu1 %v2774_v3  ;;  %2318 = vmatprep.mubr.msk.f32.mxu1 %vm2775_vm1, %v2776_v4 }
 0x859   :  { %2329 = vmatprep.mubr.msk.f32.mxu0 %vm2775_vm1, %v2776_v4 }
 0x85a   :  { %2552 = vmatpush3.bf16.msra.mxu0 %v2867_v12 }
 0x85b   :  { %2540 = vmatpush3.bf16.msra.mxu1 %v2909_v36  ;;  %2553 = vmatprep.subr.bf16.mxu0 %v2774_v3 }
 0x85c   :  { %2541 = vmatprep.subr.bf16.mxu1 %v2774_v3 }
 0x85f   :  { %2543 = vmatpush3.bf16.msra.mxu1 %v2919_v39 }
 0x860   :  { %2544 = vmatprep.subr.bf16.mxu1 %v2774_v3 }
 0x863   :  { %2546 = vmatpush3.bf16.msra.mxu1 %v2930_v43 }
 0x864   :  { %2565 = vmatprep.subr.bf16.mxu1 %v2774_v3 }
 0x928   :  { %v762_v20 = vpop.f32.mrb[4].mxu0 }
 0x929   :  { %v763_v21 = vadd.f32 %v2958_v48, %v762_v20  ;;  %v2290_v22 = vpop.f32.mrb[5].mxu0  ;;  %v861_v23 = vpop.f32.mrb[8].mxu1 }
 0x92a   :  { %v866_v24 = vrot.slane %v861_v23, 2  ;;  %v2301_v25 = vpop.f32.mrb[9].mxu1 }
 0x92b   :  { %2682 = vtanh.f32 %v763_v21  ;;  %v2038_v29 = vmul.f32 -1.442695, %v763_v21 }
 0x92c   :  { %v868_v26 = vadd.f32 %v866_v24, %v2886_v17 }
 0x92e   :  { %2684 = vtanh.f32 %v868_v26  ;;  %v2040_v30 = vmul.f32 -1.442695, %v868_v26 }
 0x92f   :  { %2686 = vpow2.f32 %v2038_v29 }
 0x930   :  { %2688 = vpow2.f32 %v2040_v30 }
 0x935   :  { %v2683_v27 = vpop.eup %2682 }
 0x936   :  { %775 = vrot.lane.b32.xlu0 %v2683_v27, %s2777_s28 }
 0x938   :  { %v2685_v28 = vpop.eup %2684 }
 0x939   :  { %881 = vrot.lane.b32.xlu1 %v2685_v28, %s2777_s28  ;;  %v2687_v31 = vpop.eup %2686 }
 0x93a   :  { %v2689_v32 = vpop.eup %2688  ;;  %v769_v33 = vadd.f32 1.0, %v2687_v31 }
 0x93b   :  { %v872_v35 = vadd.f32 1.0, %v2689_v32 }
 0x93c   :  { %2690 = vrcp.f32 %v769_v33 }
 0x93d   :  { %2692 = vrcp.f32 %v872_v35 }
 0x946   :  { %v2691_v37 = vpop.eup %2690 }
 0x947   :  { %v2693_v40 = vpop.eup %2692  ;;  %v773_v44 = vmul.f32 %v2691_v37, %v3005_v61 }
 0x948   :  { %v879_v49 = vmul.f32 %v2693_v40, %v877_v45 }
 0x9a8   :  { %v776_v38 = vpop.permute.xlu0 %775 }
 0x9a9   :  { %v778_v17 = vmul.f32 %v2691_v37, %v776_v38 }
 0x9ab   :  { %v882_v41 = vpop.permute.xlu1 %881  ;;  %780 = vrot.lane.b32.xlu0 %v778_v17, %s2778_s3 }
 0x9ac   :  { %v884_v42 = vmul.f32 %v2693_v40, %v882_v41 }
 0x9ae   :  { %886 = vrot.lane.b32.xlu1 %v884_v42, %s2778_s3 }
 0xa1d   :  { %v781_v46 = vpop.permute.xlu0 %780 }
 0xa1e   :  { %v3043_v47 = vadd.f32 %v781_v46, %v773_v44 }
 0xa20   :  { %2694 = vtanh.f32 %v3043_v47  ;;  %v887_v50 = vpop.permute.xlu1 %886 }
 0xa21   :  { %v3046_v51 = vadd.f32 %v887_v50, %v879_v49 }
 0xa23   :  { %2696 = vtanh.f32 %v3046_v51  ;;  %v1088_v27 = vrot.slane %v3046_v51, 6 }
 0xa2a   :  { %v2695_v52 = vpop.eup %2694 }
 0xa2b   :  { %786 = vrot.lane.b32.xlu0 %v2695_v52, %s2777_s28 }
 0xa2d   :  { %v2697_v53 = vpop.eup %2696 }
 0xa2e   :  { %892 = vrot.lane.b32.xlu1 %v2697_v53, %s2777_s28 }
 0xa9d   :  { %v787_v54 = vpop.permute.xlu0 %786 }
 0xa9e   :  { %v789_v55 = vmul.f32 %v2691_v37, %v787_v54 }
 0xaa0   :  { %v901_v56 = vrot.slane %v789_v55, 2  ;;  %v893_v57 = vpop.permute.xlu1 %892 }
 0xaa1   :  { %v895_v58 = vmul.f32 %v2693_v40, %v893_v57 }
 0xaa2   :  { %902 = vrot.lane.b32.xlu1 %v901_v56, %s2777_s28 }
 0xaa3   :  { %897 = vrot.lane.b32.xlu0 %v895_v58, %s2778_s3  ;;  %v1004_v59 = vrot.slane %v895_v58, 6 }
 0xaa7   :  { %1005 = vrot.lane.b32.xlu0 %v1004_v59, %s2778_s3 }
 0xb14   :  { %v903_v60 = vpop.permute.xlu1 %902 }
 0xb15   :  { %v898_v61 = vpop.permute.xlu0 %897 }
 0xb16   :  { %v905_v62 = vsel %vm157_vm2, %v898_v61, %v903_v60 }
 0xb17   :  { %v907_v63 = vrot.slane %v905_v62, 6 }
 0xb19   :  { %2319 = vmatmul.mubr.msk.f32.vlgmr.msra.gmra.mrb[10].mxu1 %vm267_vm3, %v907_v63  ;;  %v1006_v0 = vpop.permute.xlu0 %1005 }
 0xb1a   :  { %2330 = vmatmul.mubr.msk.f32.vlgmr.msra.gmra.mrb[6].mxu0 %vm157_vm2, %v1006_v0  ;;  %2567 = vmatpush3.bf16.msra.mxu1 %v2856_v9 }
 0xb1b   :  { %2555 = vmatpush3.bf16.msra.mxu0 %v2903_v34  ;;  %2568 = vmatprep.subr.bf16.mxu1 %v2774_v3 }
 0xb1c   :  { %2556 = vmatprep.subr.bf16.mxu0 %v2774_v3  ;;  %2359 = vmatprep.mubr.msk.f32.mxu1 %vm2775_vm1, %v2776_v4 }
 0xb1d   :  { %2348 = vmatprep.mubr.msk.f32.mxu0 %vm2775_vm1, %v2776_v4 }
 0xb1e   :  { %2570 = vmatpush3.bf16.msra.mxu1 %v2867_v12 }
 0xb1f   :  { %2558 = vmatpush3.bf16.msra.mxu0 %v2909_v36  ;;  %2571 = vmatprep.subr.bf16.mxu1 %v2774_v3 }
 0xb20   :  { %2559 = vmatprep.subr.bf16.mxu0 %v2774_v3 }
 0xb23   :  { %2561 = vmatpush3.bf16.msra.mxu0 %v2919_v39 }
 0xb24   :  { %2562 = vmatprep.subr.bf16.mxu0 %v2774_v3 }
 0xb27   :  { %2564 = vmatpush3.bf16.msra.mxu0 %v2930_v43 }
 0xb28   :  { %2583 = vmatprep.subr.bf16.mxu0 %v2774_v3 }
 0xbec   :  { %v976_v1 = vpop.f32.mrb[10].mxu1 }
 0xbed   :  { %v977_v2 = vadd.f32 %v2958_v48, %v976_v1  ;;  %v2320_v5 = vpop.f32.mrb[11].mxu1  ;;  %v1075_v6 = vpop.f32.mrb[6].mxu0 }
 0xbee   :  { %v1079_v7 = vadd.f32 %v1075_v6, %v2884_v15  ;;  %v2331_v8 = vpop.f32.mrb[7].mxu0 }
 0xbef   :  { %2698 = vtanh.f32 %v977_v2  ;;  %v2042_v13 = vmul.f32 -1.442695, %v977_v2 }
 0xbf0   :  { %2700 = vtanh.f32 %v1079_v7  ;;  %v2044_v14 = vmul.f32 -1.442695, %v1079_v7 }
 0xbf1   :  { %2702 = vpow2.f32 %v2042_v13 }
 0xbf2   :  { %2704 = vpow2.f32 %v2044_v14 }
 0xbf9   :  { %v2699_v10 = vpop.eup %2698 }
 0xbfa   :  { %v2701_v11 = vpop.eup %2700  ;;  %989 = vrot.lane.b32.xlu1 %v2699_v10, %s2777_s28 }
 0xbfb   :  { %1092 = vrot.lane.b32.xlu0 %v2701_v11, %s2777_s28  ;;  %v2703_v16 = vpop.eup %2702 }
 0xbfc   :  { %v2705_v18 = vpop.eup %2704  ;;  %v983_v19 = vadd.f32 1.0, %v2703_v16 }
 0xbfd   :  { %v1083_v20 = vadd.f32 1.0, %v2705_v18 }
 0xbfe   :  { %2706 = vrcp.f32 %v983_v19 }
 0xbff   :  { %2708 = vrcp.f32 %v1083_v20 }
 0xc08   :  { %v2707_v21 = vpop.eup %2706 }
 0xc09   :  { %v2709_v23 = vpop.eup %2708  ;;  %v987_v28 = vmul.f32 %v2707_v21, %v3043_v47 }
 0xc0a   :  { %v1090_v30 = vmul.f32 %v2709_v23, %v1088_v27 }
 0xc6c   :  { %v990_v22 = vpop.permute.xlu1 %989 }
 0xc6d   :  { %v992_v24 = vmul.f32 %v2707_v21, %v990_v22  ;;  %v1093_v25 = vpop.permute.xlu0 %1092 }
 0xc6e   :  { %v1095_v26 = vmul.f32 %v2709_v23, %v1093_v25 }
 0xc6f   :  { %994 = vrot.lane.b32.xlu1 %v992_v24, %s2778_s3 }
 0xc70   :  { %1097 = vrot.lane.b32.xlu0 %v1095_v26, %s2778_s3 }
 0xce1   :  { %v995_v29 = vpop.permute.xlu1 %994 }
 0xce2   :  { %v3081_v31 = vadd.f32 %v995_v29, %v987_v28  ;;  %v1098_v32 = vpop.permute.xlu0 %1097 }
 0xce3   :  { %v3083_v33 = vadd.f32 %v1098_v32, %v1090_v30 }
 0xce4   :  { %2710 = vtanh.f32 %v3081_v31 }
 0xce5   :  { %2712 = vtanh.f32 %v3083_v33  ;;  %v1297_v6 = vrot.slane %v3083_v33, 6 }
 0xcee   :  { %v2711_v35 = vpop.eup %2710 }
 0xcef   :  { %v2713_v37 = vpop.eup %2712  ;;  %1000 = vrot.lane.b32.xlu1 %v2711_v35, %s2777_s28 }
 0xcf0   :  { %1103 = vrot.lane.b32.xlu0 %v2713_v37, %s2777_s28 }
 0xd61   :  { %v1001_v38 = vpop.permute.xlu1 %1000 }
 0xd62   :  { %v1003_v17 = vmul.f32 %v2707_v21, %v1001_v38  ;;  %v1104_v40 = vpop.permute.xlu0 %1103 }
 0xd63   :  { %v1106_v41 = vmul.f32 %v2709_v23, %v1104_v40 }
 0xd64   :  { %1112 = vrot.lane.b32.xlu0 %v1003_v17, %s2777_s28 }
 0xd65   :  { %1108 = vrot.lane.b32.xlu1 %v1106_v41, %s2778_s3 }
 0xdd6   :  { %v1113_v42 = vpop.permute.xlu0 %1112 }
 0xdd7   :  { %v1109_v44 = vpop.permute.xlu1 %1108 }
 0xdd8   :  { %v1115_v45 = vsel %vm157_vm2, %v1109_v44, %v1113_v42  ;;  %2360 = vmatmul.mubr.msk.f32.vlgmr.msra.gmra.mrb[12].mxu1 %vm157_vm2, %v1109_v44 }
 0xdd9   :  { %2349 = vmatmul.mubr.msk.f32.vlgmr.msra.gmra.mrb[8].mxu0 %vm267_vm3, %v1115_v45  ;;  %2573 = vmatpush3.bf16.msra.mxu1 %v2903_v34 }
 0xdda   :  { %2574 = vmatprep.subr.bf16.mxu1 %v2774_v3  ;;  %2585 = vmatpush3.bf16.msra.mxu0 %v2856_v9 }
 0xddb   :  { %2586 = vmatprep.subr.bf16.mxu0 %v2774_v3  ;;  %2378 = vmatprep.mubr.msk.f32.mxu1 %vm2775_vm1, %v2776_v4 }
 0xddc   :  { %2389 = vmatprep.mubr.msk.f32.mxu0 %vm2775_vm1, %v2776_v4 }
 0xddd   :  { %2576 = vmatpush3.bf16.msra.mxu1 %v2909_v36 }
 0xdde   :  { %2577 = vmatprep.subr.bf16.mxu1 %v2774_v3  ;;  %2588 = vmatpush3.bf16.msra.mxu0 %v2867_v12 }
 0xddf   :  { %2589 = vmatprep.subr.bf16.mxu0 %v2774_v3 }
 0xde1   :  { %2579 = vmatpush3.bf16.msra.mxu1 %v2919_v39 }
 0xde2   :  { %2580 = vmatprep.subr.bf16.mxu1 %v2774_v3 }
 0xde5   :  { %2582 = vmatpush3.bf16.msra.mxu1 %v2930_v43 }
 0xde6   :  { %2601 = vmatprep.subr.bf16.mxu1 %v2774_v3 }
 0xeab   :  { %v1281_v46 = vpop.f32.mrb[12].mxu1 }
 0xeac   :  { %v1286_v47 = vrot.slane %v1281_v46, 6  ;;  %v1185_v49 = vpop.f32.mrb[8].mxu0  ;;  %v2361_v50 = vpop.f32.mrb[13].mxu1 }
 0xead   :  { %v1186_v51 = vadd.f32 %v2958_v48, %v1185_v49  ;;  %v2350_v52 = vpop.f32.mrb[9].mxu0 }
 0xeae   :  { %v1288_v53 = vadd.f32 %v1286_v47, %v2884_v15 }
 0xeaf   :  { %2714 = vtanh.f32 %v1186_v51  ;;  %v2046_v56 = vmul.f32 -1.442695, %v1186_v51 }
 0xeb0   :  { %2716 = vtanh.f32 %v1288_v53  ;;  %v2048_v57 = vmul.f32 -1.442695, %v1288_v53 }
 0xeb1   :  { %2718 = vpow2.f32 %v2046_v56 }
 0xeb2   :  { %2720 = vpow2.f32 %v2048_v57 }
 0xeb9   :  { %v2715_v54 = vpop.eup %2714 }
 0xeba   :  { %v2717_v55 = vpop.eup %2716  ;;  %1198 = vrot.lane.b32.xlu1 %v2715_v54, %s2777_s28 }
 0xebb   :  { %1301 = vrot.lane.b32.xlu0 %v2717_v55, %s2777_s28  ;;  %v2719_v58 = vpop.eup %2718 }
 0xebc   :  { %v2721_v59 = vpop.eup %2720  ;;  %v1192_v60 = vadd.f32 1.0, %v2719_v58 }
 0xebd   :  { %v1292_v61 = vadd.f32 1.0, %v2721_v59 }
 0xebe   :  { %2722 = vrcp.f32 %v1192_v60 }
 0xebf   :  { %2724 = vrcp.f32 %v1292_v61 }
 0xec8   :  { %v2723_v62 = vpop.eup %2722 }
 0xec9   :  { %v2725_v0 = vpop.eup %2724  ;;  %v1196_v7 = vmul.f32 %v2723_v62, %v3081_v31 }
 0xeca   :  { %v1299_v10 = vmul.f32 %v2725_v0, %v1297_v6 }
 0xf2c   :  { %v1199_v63 = vpop.permute.xlu1 %1198 }
 0xf2d   :  { %v1201_v1 = vmul.f32 %v2723_v62, %v1199_v63  ;;  %v1302_v2 = vpop.permute.xlu0 %1301 }
 0xf2e   :  { %v1304_v5 = vmul.f32 %v2725_v0, %v1302_v2 }
 0xf2f   :  { %1203 = vrot.lane.b32.xlu1 %v1201_v1, %s2778_s3 }
 0xf30   :  { %1306 = vrot.lane.b32.xlu0 %v1304_v5, %s2778_s3 }
 0xfa1   :  { %v1204_v8 = vpop.permute.xlu1 %1203 }
 0xfa2   :  { %v3118_v11 = vadd.f32 %v1204_v8, %v1196_v7  ;;  %v1307_v13 = vpop.permute.xlu0 %1306 }
 0xfa3   :  { %v3120_v14 = vadd.f32 %v1307_v13, %v1299_v10 }
 0xfa4   :  { %2726 = vtanh.f32 %v3118_v11 }
 0xfa5   :  { %2728 = vtanh.f32 %v3120_v14  ;;  %v1511_v54 = vrot.slane %v3120_v14, 6 }
 0xfae   :  { %v2727_v16 = vpop.eup %2726 }
 0xfaf   :  { %v2729_v18 = vpop.eup %2728  ;;  %1209 = vrot.lane.b32.xlu1 %v2727_v16, %s2777_s28 }
 0xfb0   :  { %1312 = vrot.lane.b32.xlu0 %v2729_v18, %s2777_s28 }
0x1021   :  { %v1210_v19 = vpop.permute.xlu1 %1209 }
0x1022   :  { %v1212_v20 = vmul.f32 %v2723_v62, %v1210_v19  ;;  %v1313_v21 = vpop.permute.xlu0 %1312 }
0x1023   :  { %v1315_v22 = vmul.f32 %v2725_v0, %v1313_v21 }
0x1024   :  { %v1321_v23 = vrot.slane %v1212_v20, 6 }
0x1025   :  { %1317 = vrot.lane.b32.xlu1 %v1315_v22, %s2778_s3  ;;  %v1424_v24 = vrot.slane %v1315_v22, 2 }
0x1026   :  { %1322 = vrot.lane.b32.xlu0 %v1321_v23, %s2777_s28 }
0x1029   :  { %1425 = vrot.lane.b32.xlu1 %v1424_v24, %s2778_s3 }
0x1097   :  { %v1318_v25 = vpop.permute.xlu1 %1317 }
0x1098   :  { %v1323_v26 = vpop.permute.xlu0 %1322 }
0x1099   :  { %v1325_v27 = vsel %vm157_vm2, %v1318_v25, %v1323_v26 }
0x109a   :  { %v1327_v28 = vrot.slane %v1325_v27, 2 }
0x109b   :  { %v1426_v29 = vpop.permute.xlu1 %1425 }
0x109c   :  { %2379 = vmatmul.mubr.msk.f32.vlgmr.msra.gmra.mrb[14].mxu1 %vm267_vm3, %v1327_v28  ;;  %2390 = vmatmul.mubr.msk.f32.vlgmr.msra.gmra.mrb[10].mxu0 %vm157_vm2, %v1426_v29 }
0x109d   :  { %2591 = vmatpush3.bf16.msra.mxu0 %v2903_v34  ;;  %2603 = vmatpush3.bf16.msra.mxu1 %v2856_v9 }
0x109e   :  { %2592 = vmatprep.subr.bf16.mxu0 %v2774_v3  ;;  %2604 = vmatprep.subr.bf16.mxu1 %v2774_v3 }
0x109f   :  { %2408 = vmatprep.mubr.msk.f32.mxu0 %vm2775_vm1, %v2776_v4  ;;  %2419 = vmatprep.mubr.msk.f32.mxu1 %vm2775_vm1, %v2776_v4 }
0x10a1   :  { %2594 = vmatpush3.bf16.msra.mxu0 %v2909_v36  ;;  %2606 = vmatpush3.bf16.msra.mxu1 %v2867_v12 }
0x10a2   :  { %2595 = vmatprep.subr.bf16.mxu0 %v2774_v3  ;;  %2607 = vmatprep.subr.bf16.mxu1 %v2774_v3 }
0x10a5   :  { %2597 = vmatpush3.bf16.msra.mxu0 %v2919_v39 }
0x10a6   :  { %2598 = vmatprep.subr.bf16.mxu0 %v2774_v3 }
0x10a9   :  { %2600 = vmatpush3.bf16.msra.mxu0 %v2930_v43 }
0x10aa   :  { %2619 = vmatprep.subr.bf16.mxu0 %v2774_v3 }
0x116f   :  { %v1396_v9 = vpop.f32.mrb[14].mxu1  ;;  %v1495_v30 = vpop.f32.mrb[10].mxu0 }
0x1170   :  { %v1397_v31 = vadd.f32 %v2958_v48, %v1396_v9  ;;  %v1500_v32 = vrot.slane %v1495_v30, 4  ;;  %v2380_v33 = vpop.f32.mrb[15].mxu1  ;;  %v2391_v35 = vpop.f32.mrb[11].mxu0 }
0x1172   :  { %2730 = vtanh.f32 %v1397_v31  ;;  %v1502_v12 = vadd.f32 %v1500_v32, %v2884_v15  ;;  %v2050_v17 = vmul.f32 -1.442695, %v1397_v31 }
0x1174   :  { %2732 = vtanh.f32 %v1502_v12  ;;  %v2052_v40 = vmul.f32 -1.442695, %v1502_v12 }
0x1175   :  { %2734 = vpow2.f32 %v2050_v17 }
0x1176   :  { %2736 = vpow2.f32 %v2052_v40 }
0x117c   :  { %v2731_v37 = vpop.eup %2730 }
0x117d   :  { %1409 = vrot.lane.b32.xlu0 %v2731_v37, %s2777_s28 }
0x117e   :  { %v2733_v38 = vpop.eup %2732 }
0x117f   :  { %1515 = vrot.lane.b32.xlu1 %v2733_v38, %s2777_s28  ;;  %v2735_v41 = vpop.eup %2734 }
0x1180   :  { %v2737_v42 = vpop.eup %2736  ;;  %v1403_v44 = vadd.f32 1.0, %v2735_v41 }
0x1181   :  { %v1506_v45 = vadd.f32 1.0, %v2737_v42 }
0x1182   :  { %2738 = vrcp.f32 %v1403_v44 }
0x1183   :  { %2740 = vrcp.f32 %v1506_v45 }
0x118c   :  { %v2739_v46 = vpop.eup %2738 }
0x118d   :  { %v2741_v50 = vpop.eup %2740  ;;  %v1407_v53 = vmul.f32 %v2739_v46, %v3118_v11 }
0x118e   :  { %v1513_v57 = vmul.f32 %v2741_v50, %v1511_v54 }
0x11ef   :  { %v1410_v47 = vpop.permute.xlu0 %1409 }
0x11f0   :  { %v1412_v49 = vmul.f32 %v2739_v46, %v1410_v47 }
0x11f1   :  { %v1516_v51 = vpop.permute.xlu1 %1515 }
0x11f2   :  { %1414 = vrot.lane.b32.xlu0 %v1412_v49, %s2778_s3  ;;  %v1518_v52 = vmul.f32 %v2741_v50, %v1516_v51 }
0x11f4   :  { %1520 = vrot.lane.b32.xlu1 %v1518_v52, %s2778_s3 }
0x1264   :  { %v1415_v55 = vpop.permute.xlu0 %1414 }
0x1265   :  { %v3156_v56 = vadd.f32 %v1415_v55, %v1407_v53 }
0x1266   :  { %v1521_v58 = vpop.permute.xlu1 %1520 }
0x1267   :  { %2742 = vtanh.f32 %v3156_v56  ;;  %v3159_v59 = vadd.f32 %v1521_v58, %v1513_v57 }
0x1269   :  { %2744 = vtanh.f32 %v3159_v59  ;;  %v1725_v31 = vrot.slane %v3159_v59, 6 }
0x1271   :  { %v2743_v60 = vpop.eup %2742 }
0x1272   :  { %1420 = vrot.lane.b32.xlu0 %v2743_v60, %s2777_s28 }
0x1273   :  { %v2745_v61 = vpop.eup %2744 }
0x1274   :  { %1526 = vrot.lane.b32.xlu1 %v2745_v61, %s2777_s28 }
0x12e4   :  { %v1421_v62 = vpop.permute.xlu0 %1420 }
0x12e5   :  { %v1423_v63 = vmul.f32 %v2739_v46, %v1421_v62 }
0x12e6   :  { %v1527_v1 = vpop.permute.xlu1 %1526 }
0x12e7   :  { %v1535_v0 = vrot.slane %v1423_v63, 4  ;;  %v1529_v2 = vmul.f32 %v2741_v50, %v1527_v1  ;;  %v57_v1 = vld [vmem:[%s3260_s6 + $0x10] sm:$0xff] }
0x12e9   :  { %1536 = vrot.lane.b32.xlu1 %v1535_v0, %s2777_s28  ;;  %1531 = vrot.lane.b32.xlu0 %v1529_v2, %s2778_s3  ;;  %v1638_v5 = vrot.slane %v1529_v2, 4  ;;  %v56_v0 = vld [vmem:[%s3260_s6 + $0x8] sm:$0xff] }
0x12ed   :  { %1639 = vrot.lane.b32.xlu0 %v1638_v5, %s2778_s3  ;;  %v58_v5 = vld [vmem:[%s3260_s6 + $0x18] sm:$0xff] }
0x135b   :  { %v1537_v6 = vpop.permute.xlu1 %1536  ;;  %v1532_v7 = vpop.permute.xlu0 %1531 }
0x135c   :  { %v1539_v8 = vsel %vm157_vm2, %v1532_v7, %v1537_v6  ;;  %v2623_v6 = vpack.c.bf16 %v58_v5, %v57_v1 }
0x135d   :  { %v1541_v10 = vrot.slane %v1539_v8, 4 }
0x135f   :  { %v1640_v11 = vpop.permute.xlu0 %1639  ;;  %2409 = vmatmul.mubr.msk.f32.vlgmr.msra.gmra.mrb[12].mxu0 %vm267_vm3, %v1541_v10 }
0x1360   :  { %2420 = vmatmul.mubr.msk.f32.vlgmr.msra.gmra.mrb[16].mxu1 %vm157_vm2, %v1640_v11  ;;  %2449 = vmatprep.mubr.msk.f32.mxu0 %vm2775_vm1, %v2776_v4  ;;  %v60_v11 = vld [vmem:[%s3261_s8] sm:$0xff] }
0x1361   :  { %2609 = vmatpush3.bf16.msra.mxu1 %v2903_v34  ;;  %2438 = vmatprep.mubr.msk.f32.mxu1 %vm2775_vm1, %v2776_v4 }
0x1362   :  { %2610 = vmatprep.subr.bf16.mxu1 %v2774_v3 }
0x1365   :  { %2612 = vmatpush3.bf16.msra.mxu1 %v2909_v36 }
0x1366   :  { %2613 = vmatprep.subr.bf16.mxu1 %v2774_v3 }
0x1369   :  { %2615 = vmatpush3.bf16.msra.mxu1 %v2919_v39 }
0x136a   :  { %2616 = vmatprep.subr.bf16.mxu1 %v2774_v3 }
0x136d   :  { %2618 = vmatpush3.bf16.msra.mxu1 %v2930_v43 }
0x1432   :  { %v1610_v13 = vpop.f32.mrb[12].mxu0 }
0x1433   :  { %v1611_v14 = vadd.f32 %v2958_v48, %v1610_v13  ;;  %v2410_v16 = vpop.f32.mrb[13].mxu0  ;;  %v1709_v34 = vpop.f32.mrb[16].mxu1  ;;  %v61_v13 = vld [vmem:[%s3261_s8 + $0x8] sm:$0xff] }
0x1434   :  { %v1714_v18 = vrot.slane %v1709_v34, 2  ;;  %v2421_v19 = vpop.f32.mrb[17].mxu1  ;;  %v62_v16 = vld [vmem:[%s3261_s8 + $0x10] sm:$0xff]  ;;  %v63_v34 = vld [vmem:[%s3261_s8 + $0x18] sm:$0xff] }
0x1435   :  { %2746 = vtanh.f32 %v1611_v14  ;;  %v2054_v39 = vmul.f32 -1.442695, %v1611_v14  ;;  %v2626_v14 = vpack.c.bf16 %v61_v13, %v60_v11  ;;  %v2629_v19 = vpack.c.bf16 %v63_v34, %v62_v16 }
0x1436   :  { %v1716_v20 = vadd.f32 %v1714_v18, %v2884_v15 }
0x1438   :  { %2748 = vtanh.f32 %v1716_v20  ;;  %v2056_v22 = vmul.f32 -1.442695, %v1716_v20  ;;  %v64_v20 = vld [vmem:[%s3261_s8 + $0x20] sm:$0xff] }
0x1439   :  { %2750 = vpow2.f32 %v2054_v39  ;;  %v67_v39 = vld [vmem:[%s3261_s8 + $0x38] sm:$0xff] }
0x143a   :  { %2752 = vpow2.f32 %v2056_v22 }
0x143f   :  { %v2747_v36 = vpop.eup %2746 }
0x1440   :  { %1623 = vrot.lane.b32.xlu1 %v2747_v36, %s2777_s28  ;;  %v65_v36 = vld [vmem:[%s3261_s8 + $0x28] sm:$0xff] }
0x1442   :  { %v2749_v21 = vpop.eup %2748 }
0x1443   :  { %1729 = vrot.lane.b32.xlu0 %v2749_v21, %s2777_s28  ;;  %v2751_v43 = vpop.eup %2750  ;;  %v2632_v21 = vpack.c.bf16 %v65_v36, %v64_v20 }
0x1444   :  { %v2753_v23 = vpop.eup %2752  ;;  %v1617_v24 = vadd.f32 1.0, %v2751_v43  ;;  %v15_v43 = vstv %s3262_s9 }
0x1445   :  { %v1720_v25 = vadd.f32 1.0, %v2753_v23  ;;  %16 = vst [vmem:[#allocation2] sm:$0x1] %v15_v43  ;;  %v2059_v23 = vld [vmem:[%s3263_s7] ss:$0 sm:$0xff] }
0x1446   :  { %2754 = vrcp.f32 %v1617_v24 }
0x1447   :  { %2756 = vrcp.f32 %v1720_v25 }
0x1450   :  { %v2755_v26 = vpop.eup %2754 }
0x1451   :  { %v2757_v28 = vpop.eup %2756  ;;  %v1621_v30 = vmul.f32 %v2755_v26, %v3156_v56 }
0x1452   :  { %v1727_v35 = vmul.f32 %v2757_v28, %v1725_v31 }
0x14b2   :  { %v1624_v27 = vpop.permute.xlu1 %1623 }
0x14b3   :  { %v1626_v15 = vmul.f32 %v2755_v26, %v1624_v27 }
0x14b5   :  { %v1730_v29 = vpop.permute.xlu0 %1729  ;;  %1628 = vrot.lane.b32.xlu1 %v1626_v15, %s2778_s3 }
0x14b6   :  { %v1732_v9 = vmul.f32 %v2757_v28, %v1730_v29 }
0x14b8   :  { %1734 = vrot.lane.b32.xlu0 %v1732_v9, %s2778_s3 }
0x1527   :  { %v1629_v32 = vpop.permute.xlu1 %1628 }
0x1528   :  { %v1631_v33 = vadd.f32 %v1629_v32, %v1621_v30 }
0x152a   :  { %2758 = vtanh.f32 %v1631_v33  ;;  %v1735_v12 = vpop.permute.xlu0 %1734 }
0x152b   :  { %v1737_v37 = vadd.f32 %v1735_v12, %v1727_v35 }
0x152d   :  { %2760 = vtanh.f32 %v1737_v37 }
0x1534   :  { %v2759_v38 = vpop.eup %2758 }
0x1535   :  { %1634 = vrot.lane.b32.xlu1 %v2759_v38, %s2777_s28 }
0x1537   :  { %v2761_v17 = vpop.eup %2760 }
0x1538   :  { %1740 = vrot.lane.b32.xlu0 %v2761_v17, %s2777_s28 }
0x15a7   :  { %v1635_v40 = vpop.permute.xlu1 %1634 }
0x15a8   :  { %v1637_v41 = vmul.f32 %v2755_v26, %v1635_v40  ;;  %v2061_v26 = vld [vmem:[#allocation2] ss:$0 sm:$0xff] }
0x15aa   :  { %v1749_v42 = vrot.slane %v1637_v41, 2  ;;  %v1741_v44 = vpop.permute.xlu0 %1740 }
0x15ab   :  { %v1743_v45 = vmul.f32 %v2757_v28, %v1741_v44 }
0x15ac   :  { %1750 = vrot.lane.b32.xlu0 %v1749_v42, %s2777_s28 }
0x15ad   :  { %1745 = vrot.lane.b32.xlu1 %v1743_v45, %s2778_s3 }
0x161e   :  { %v1751_v46 = vpop.permute.xlu0 %1750 }
0x161f   :  { %v1746_v47 = vpop.permute.xlu1 %1745 }
0x1620   :  { %v1753_v49 = vsel %vm157_vm2, %v1746_v47, %v1751_v46 }
0x1621   :  { %v1755_v50 = vrot.slane %v1753_v49, 6 }
0x1623   :  { %2439 = vmatmul.mubr.msk.f32.vlgmr.msra.gmra.mrb[18].mxu1 %vm267_vm3, %v1755_v50 }
0x16f6   :  { %v1824_v51 = vpop.f32.mrb[18].mxu1 }
0x16f7   :  { %v1825_v52 = vadd.f32 %v2958_v48, %v1824_v51  ;;  %v2440_v53 = vpop.f32.mrb[19].mxu1  ;;  %v55_v48 = vld [vmem:[%s3260_s6] sm:$0xff] }
0x16f8   :  { %v2620_v2 = vpack.c.bf16 %v56_v0, %v55_v48 }
0x16f9   :  { %2762 = vtanh.f32 %v1825_v52  ;;  %v2058_v55 = vmul.f32 -1.442695, %v1825_v52 }
0x16fa   :  { %2621 = vmatpush3.bf16.msra.mxu0 %v2620_v2 }
0x16fb   :  { %2764 = vpow2.f32 %v2058_v55  ;;  %2622 = vmatprep.subr.bf16.mxu0 %v2774_v3 }
0x16fe   :  { %2624 = vmatpush3.bf16.msra.mxu0 %v2623_v6 }
0x16ff   :  { %2625 = vmatprep.subr.bf16.mxu0 %v2774_v3 }
0x1703   :  { %v2763_v54 = vpop.eup %2762 }
0x1704   :  { %1837 = vrot.lane.b32.xlu1 %v2763_v54, %s2777_s28 }
0x1705   :  { %v2765_v56 = vpop.eup %2764 }
0x1706   :  { %v1831_v57 = vadd.f32 1.0, %v2765_v56 }
0x1708   :  { %2766 = vrcp.f32 %v1831_v57 }
0x1712   :  { %v2767_v58 = vpop.eup %2766 }
0x1713   :  { %v1835_v61 = vmul.f32 %v2767_v58, %v1631_v33 }
0x1776   :  { %v1838_v59 = vpop.permute.xlu1 %1837 }
0x1777   :  { %v1840_v60 = vmul.f32 %v2767_v58, %v1838_v59 }
0x1779   :  { %1842 = vrot.lane.b32.xlu0 %v1840_v60, %s2778_s3 }
0x17eb   :  { %v1843_v62 = vpop.permute.xlu0 %1842 }
0x17ec   :  { %v1845_v63 = vadd.f32 %v1843_v62, %v1835_v61 }
0x17ee   :  { %2768 = vtanh.f32 %v1845_v63 }
0x17f8   :  { %v2769_v7 = vpop.eup %2768 }
0x17f9   :  { %1848 = vrot.lane.b32.xlu1 %v2769_v7, %s2777_s28 }
0x186b   :  { %v1849_v8 = vpop.permute.xlu1 %1848 }
0x186c   :  { %v1851_v10 = vmul.f32 %v2767_v58, %v1849_v8 }
0x186e   :  { %1859 = vrot.lane.b32.xlu0 %v1851_v10, %s2778_s3 }
0x18e0   :  { %v1860_v18 = vpop.permute.xlu0 %1859 }
0x18e1   :  { %2450 = vmatmul.mubr.msk.f32.vlgmr.msra.gmra.mrb[14].mxu0 %vm157_vm2, %v1860_v18 }
0x18e2   :  { %2627 = vmatpush3.bf16.msra.mxu0 %v2626_v14  ;;  %2468 = vmatprep.mubr.msk.f32.mxu0 %vm2775_vm1, %v2776_v4  ;;  %v66_v4 = vld [vmem:[%s3261_s8 + $0x30] sm:$0xff] }
0x18e3   :  { %2628 = vmatprep.subr.bf16.mxu0 %v2774_v3  ;;  %v2635_v22 = vpack.c.bf16 %v67_v39, %v66_v4 }
0x18e6   :  { %2630 = vmatpush3.bf16.msra.mxu0 %v2629_v19 }
0x18e7   :  { %2631 = vmatprep.subr.bf16.mxu0 %v2774_v3 }
0x18ea   :  { %2633 = vmatpush3.bf16.msra.mxu0 %v2632_v21 }
0x18eb   :  { %2634 = vmatprep.subr.bf16.mxu0 %v2774_v3 }
0x18ee   :  { %2636 = vmatpush3.bf16.msra.mxu0 %v2635_v22 }
0x19b4   :  { %v1929_v3 = vpop.f32.mrb[14].mxu0 }
0x19b5   :  { %v1930_v24 = vadd.f32 %v2059_v23, %v1929_v3  ;;  %v2451_v25 = vpop.f32.mrb[15].mxu0 }
0x19b7   :  { %2469 = vmatmul.mubr.msk.f32.vlgmr.msra.gmra.mrb[16].mxu0 %vm267_vm3, %v1930_v24 }
0x1a8a   :  { %v2008_v27 = vpop.f32.mrb[16].mxu0 }
0x1a8b   :  { %v2009_v15 = vadd.f32 %v2061_v26, %v2008_v27  ;;  %v2470_v28 = vpop.f32.mrb[17].mxu0 }
0x1a8d   :  { %v2063_v29 = vmul.f32 -1.442695, %v2009_v15 }
0x1a8f   :  { %2770 = vpow2.f32 %v2063_v29 }
0x1a99   :  { %v2771_v9 = vpop.eup %2770 }
0x1a9a   :  { %v2015_v30 = vadd.f32 1.0, %v2771_v9 }
0x1a9c   :  { %2772 = vrcp.f32 %v2015_v30 }
0x1aa6   :  { %v2773_v31 = vpop.eup %2772 }
0x1aa7   :  { %2019 = vst.msk [vmem:[%s3264_s10] sm:$0x3] %vm2018_vm4, %v2773_v31 }

</bundles_post_ra>
